<compile_context>
chip_gen: v7x
topology: tpu7x:2x2x1
jax: 0.10.0
libtpu: 0.0.40
codegen_flags: <defaults>
</compile_context>

<pallas_src>
import functools

import jax
import jax.numpy as jnp
from jax import lax
from jax.experimental import pallas as pl
from jax.experimental.pallas import tpu as pltpu


# ----------------------------------------------------------------------------
# Pallas kernel: one batch tile of the adjacency-polynomial series
# ----------------------------------------------------------------------------
def _reachability_kernel(idx_ref, adj_ref, coeffs_ref, out_ref, *,
                         num_tau, order, n_nodes, compute_dtype):
    tb = idx_ref.shape[-1]

    # Build the one-hot monome_0 for this batch tile in-register:
    # one_hot[i, j] = (i == batch_indices[j])
    idx = idx_ref[...]                                           # (1, tb) int32
    row = lax.broadcasted_iota(jnp.int32, (n_nodes, tb), 0)      # (N, tb)
    mono = (row == idx).astype(jnp.float32)                      # (N, tb) f32

    # Order-0 term of the series for every tau.
    for t in range(num_tau):
        out_ref[t] = coeffs_ref[t, 0] * mono

    # Statically unrolled polynomial recursion:
    #   monome_{k+1} = A_k @ monome_k   (bf16 inputs, f32 MXU accumulation)
    #   out[tau]    += coeffs[tau, k+1] * monome_{k+1}
    for k in range(order):
        mono = jnp.dot(adj_ref[k], mono.astype(compute_dtype),
                       preferred_element_type=jnp.float32)
        for t in range(num_tau):
            out_ref[t] = out_ref[t] + coeffs_ref[t, k + 1] * mono


def reachability_pallas(adj_stack, batch_indices, coeffs, *,
                        tile_b=128, use_bf16=True):
    """adj_stack: (order, N, N); batch_indices: (B,) int; coeffs: (num_tau, order+1)."""
    order, n, _ = adj_stack.shape
    num_tau = coeffs.shape[0]
    coeffs = coeffs.astype(jnp.float32)
    batch_indices = jnp.asarray(batch_indices, jnp.int32).reshape(-1)
    b = batch_indices.shape[0]

    # order == 0: empty adjacency stack; the series is just the order-0 term.
    if order == 0:
        mono0 = create_batch(n, batch_indices)
        return coeffs[:, 0][:, None, None] * mono0[None]

    compute_dtype = jnp.bfloat16 if use_bf16 else jnp.float32
    adj_stack = adj_stack.astype(compute_dtype)

    # Pad B up to a multiple of tile_b so output stores are lane-dense.
    num_b_tiles = -(-b // tile_b)
    b_pad = num_b_tiles * tile_b
    if b_pad != b:
        batch_indices = jnp.pad(batch_indices, (0, b_pad - b))
    idx = batch_indices.reshape(1, b_pad)

    # Explicit VMEM budget: resident adjacency stack (+ pipeline buffer),
    # double-buffered output tile, index tile, and monome temporaries.
    itemsize = jnp.dtype(compute_dtype).itemsize
    needed = (2 * order * n * n * itemsize
              + 2 * num_tau * n * tile_b * 4
              + 2 * tile_b * 4
              + 4 * n * tile_b * 4)
    vmem_limit = int(min(max(2 * needed, 32 * 1024 * 1024), 64 * 1024 * 1024))

    kernel = functools.partial(_reachability_kernel, num_tau=num_tau,
                               order=order, n_nodes=n,
                               compute_dtype=compute_dtype)

    out = pl.pallas_call(
        kernel,
        out_shape=jax.ShapeDtypeStruct((num_tau, n, b_pad), jnp.float32),
        grid_spec=pltpu.PrefetchScalarGridSpec(
            num_scalar_prefetch=0,
            grid=(num_b_tiles,),
            in_specs=[
                # int32 source-node indices for this batch tile.
                pl.BlockSpec((1, tile_b), lambda bi: (0, bi)),
                # Full oriented-adjacency stack, resident (constant block index).
                pl.BlockSpec((order, n, n), lambda bi: (0, 0, 0)),
                # Taylor coefficients: tiny scalar table in SMEM.
                pl.BlockSpec(memory_space=pltpu.MemorySpace.SMEM),
            ],
            out_specs=pl.BlockSpec((num_tau, n, tile_b),
                                   lambda bi: (0, 0, bi)),
        ),
        compiler_params=pltpu.CompilerParams(
            dimension_semantics=("parallel",),
            vmem_limit_bytes=vmem_limit),
    )(idx, adj_stack, coeffs)

    if b_pad != b:
        out = out[:, :, :b]
    return out


# ----------------------------------------------------------------------------
# Plain-JAX glue reproducing TorchAdj normalizations / AdjSeq / _create_batch
# ----------------------------------------------------------------------------
def orientation_matrix(adj, orientation):
    """Dense equivalents of adjutils.TorchAdj normalized matrices.
    Convention: adj[i, j] is edge i -> j; d_out = row sums, d_in = column sums.
    """
    def inv(d):
        return jnp.where(d > 0, 1.0 / d, 0.0)

    d_out = adj.sum(axis=1)
    d_in = adj.sum(axis=0)
    DA = inv(d_out)[:, None] * adj          # D_out^{-1} A
    AD = adj * inv(d_in)[None, :]           # A D_in^{-1}
    if orientation == 'O':
        return AD
    if orientation == 'I':
        return DA.T
    if orientation == 'F':
        return DA
    if orientation == 'B':
        return AD.T
    if orientation == 'X':
        return jnp.sqrt(inv(d_out))[:, None] * adj * jnp.sqrt(inv(d_in))[None, :]
    if orientation == 'A':
        return adj
    if orientation == 'T':
        return adj.T
    if orientation in ('U', 'C', 'S'):
        u = jnp.minimum(adj + adj.T, 1.0)   # symmetrized (undirected) adjacency
        du = u.sum(axis=1)
        UD = u * inv(du)[None, :]
        if orientation == 'U':
            return UD
        if orientation == 'C':
            return UD.T
        return jnp.sqrt(inv(du))[:, None] * u * jnp.sqrt(inv(du))[None, :]
    raise ValueError(f"Unrecognized adjacency matrix orientation '{orientation}'.")


def adj_seq_sequence(seq: str, order: int):
    """AdjSeq.sequence(order): cycle the orientation string to length `order`."""
    return [seq[i % len(seq)] for i in range(order)]


def create_batch(n_nodes: int, node_indices):
    """_create_batch: one-hot columns v[node_indices[j], j] = 1."""
    node_indices = jnp.asarray(node_indices).reshape(-1)
    b = node_indices.shape[0]
    v = jnp.zeros((n_nodes, b), dtype=jnp.float32)
    return v.at[node_indices, jnp.arange(b)].set(1.0)


def poisson_coeffs(taus, order):
    """Deterministic stand-in for RWLCoefficientsModel(): Poisson(tau) weights
    over walk lengths 0..order, shape (num_tau, order+1)."""
    ks = jnp.arange(order + 1, dtype=jnp.float32)
    log_fact = jnp.cumsum(jnp.log(jnp.maximum(ks, 1.0)))
    taus = jnp.asarray(taus, dtype=jnp.float32)[:, None]
    return jnp.exp(-taus + ks[None, :] * jnp.log(taus) - log_fact[None, :])


def reachability_reference_mixed(adj_stack_lp, monome0, coeffs):
    """Pure-JAX reference mirroring the kernel's precision (low-precision
    adjacency/monome inputs, f32 accumulation)."""
    monome = monome0.astype(jnp.float32)
    out = coeffs[:, 0][:, None, None] * monome[None]
    for k in range(adj_stack_lp.shape[0]):
        monome = jnp.dot(adj_stack_lp[k], monome.astype(adj_stack_lp.dtype),
                         preferred_element_type=jnp.float32)
        out = out + coeffs[:, k + 1][:, None, None] * monome[None]
    return out


def reachability_reference_f32(adj_stack, monome0, coeffs):
    """Pure-JAX full-f32 reference (mirrors compute_reachability exactly)."""
    monome = monome0
    out = coeffs[:, 0][:, None, None] * monome[None]
    for k in range(adj_stack.shape[0]):
        monome = adj_stack[k] @ monome
        out = out + coeffs[:, k + 1][:, None, None] * monome[None]
    return out


# TODO(synk): ew_filter (FilterModel) is Optional and None here; the
#             torch_sparse adjacency path is not implemented (dense only).

if __name__ == "__main__":
    key = jax.random.PRNGKey(0)
    n_nodes = 128      # graph size
    batch = 200        # number of source-node columns (exercises padding to 256)
    order = 4          # polynomial order (coeffs has order+1 columns)
    taus = [1.0, 2.0]  # num_tau = 2
    adj_seq = "OI"     # alternating out / in orientations

    k_adj, k_idx = jax.random.split(key)
    # Deterministic random directed adjacency (no self loops), float32.
    adj = (jax.random.uniform(k_adj, (n_nodes, n_nodes)) < 0.1).astype(jnp.float32)
    adj = adj * (1.0 - jnp.eye(n_nodes, dtype=jnp.float32))

    batch_indices = jax.random.randint(k_idx, (batch,), 0, n_nodes)

    # Glue: coefficients and the per-step oriented adjacency stack.
    coeffs = poisson_coeffs(taus, order)                               # (num_tau, order+1)
    seq = adj_seq_sequence(adj_seq, order)
    adj_stack = jnp.stack([orientation_matrix(adj, o) for o in seq])   # (order, N, N) f32

    out = reachability_pallas(adj_stack, batch_indices, coeffs,
                              tile_b=128, use_bf16=True)
    out = jax.block_until_ready(out)
    assert out.shape == (len(taus), n_nodes, batch)

    monome0 = create_batch(n_nodes, batch_indices)                     # (N, B) f32
    # Tight check vs a reference with matching precision (bf16 inputs, f32 acc).
    ref_mixed = reachability_reference_mixed(adj_stack.astype(jnp.bfloat16),
                                             monome0, coeffs)
    assert jnp.allclose(out, ref_mixed, rtol=1e-4, atol=1e-5), \
        "mismatch vs matched-precision reference"
    # Loose sanity check vs the full-f32 semantics of the original module.
    ref_f32 = reachability_reference_f32(adj_stack, monome0, coeffs)
    assert jnp.allclose(out, ref_f32, rtol=5e-2, atol=5e-2), \
        "mismatch vs f32 reference beyond bf16 tolerance"

    print("KERNEL_OK")
</pallas_src>

<mosaic_0001>
module attributes {stable_mosaic.version = 11 : i64} {
  func.func @_reachability_kernel(%arg0: i32, %arg1: memref<1x128xi32, #tpu.memory_space<vmem>>, %arg2: memref<4x128x128xbf16, #tpu.memory_space<vmem>>, %arg3: memref<2x5xf32, #tpu.memory_space<smem>>, %arg4: memref<2x128x128xf32, #tpu.memory_space<vmem>>) attributes {dimension_semantics = [#tpu.dimension_semantics<parallel>], iteration_bounds = array<i64: 2>, scalar_prefetch = 0 : i64, scratch_operands = 0 : i64, tpu.core_type = #tpu.core_type<tc>, window_params = [{transform_indices = @transform_0, window_bounds = array<i64: 1, 128>}, {pipeline_mode = #tpu.pipeline_mode<synchronous>, transform_indices = @transform_1, window_bounds = array<i64: 4, 128, 128>}, {transform_indices = @transform_2, window_bounds = array<i64: 2, 5>}, {transform_indices = @transform_3, window_bounds = array<i64: 2, 128, 128>}]} {
    %c0 = arith.constant 0 : index
    %c0_0 = arith.constant 0 : index
    %0 = vector.load %arg1[%c0, %c0_0] : memref<1x128xi32, #tpu.memory_space<vmem>>, vector<1x128xi32>
    %1 = tpu.iota {dimensions = array<i32: 0>} : vector<128x128xi32>
    %2 = vector.broadcast %0 : vector<1x128xi32> to vector<128x128xi32>
    %3 = arith.cmpi eq, %1, %2 : vector<128x128xi32>
    %4 = arith.extui %3 : vector<128x128xi1> to vector<128x128xi32>
    %5 = arith.sitofp %4 : vector<128x128xi32> to vector<128x128xf32>
    %c0_1 = arith.constant 0 : index
    %c0_2 = arith.constant 0 : index
    %6 = memref.load %arg3[%c0_1, %c0_2] : memref<2x5xf32, #tpu.memory_space<smem>>
    %7 = vector.broadcast %6 : f32 to vector<128x128xf32>
    %8 = arith.mulf %7, %5 : vector<128x128xf32>
    %c0_3 = arith.constant 0 : index
    %c0_4 = arith.constant 0 : index
    %c0_5 = arith.constant 0 : index
    %9 = vector.load %arg4[%c0_3, %c0_4, %c0_5] : memref<2x128x128xf32, #tpu.memory_space<vmem>>, vector<1x128x128xf32>
    %10 = vector.shape_cast %9 : vector<1x128x128xf32> to vector<128x128xf32>
    %11 = vector.shape_cast %8 : vector<128x128xf32> to vector<1x128x128xf32>
    tpu.vector_store %arg4[%c0_3, %c0_4, %c0_5], %11 {strides = array<i32>} : memref<2x128x128xf32, #tpu.memory_space<vmem>>, vector<1x128x128xf32>,
    %c1 = arith.constant 1 : index
    %c0_6 = arith.constant 0 : index
    %12 = memref.load %arg3[%c1, %c0_6] : memref<2x5xf32, #tpu.memory_space<smem>>
    %13 = vector.broadcast %12 : f32 to vector<128x128xf32>
    %14 = arith.mulf %13, %5 : vector<128x128xf32>
    %c1_7 = arith.constant 1 : index
    %c0_8 = arith.constant 0 : index
    %c0_9 = arith.constant 0 : index
    %15 = vector.load %arg4[%c1_7, %c0_8, %c0_9] : memref<2x128x128xf32, #tpu.memory_space<vmem>>, vector<1x128x128xf32>
    %16 = vector.shape_cast %15 : vector<1x128x128xf32> to vector<128x128xf32>
    %17 = vector.shape_cast %14 : vector<128x128xf32> to vector<1x128x128xf32>
    tpu.vector_store %arg4[%c1_7, %c0_8, %c0_9], %17 {strides = array<i32>} : memref<2x128x128xf32, #tpu.memory_space<vmem>>, vector<1x128x128xf32>,
    %c0_10 = arith.constant 0 : index
    %c0_11 = arith.constant 0 : index
    %c0_12 = arith.constant 0 : index
    %18 = vector.load %arg2[%c0_10, %c0_11, %c0_12] : memref<4x128x128xbf16, #tpu.memory_space<vmem>>, vector<1x128x128xbf16>
    %19 = vector.shape_cast %18 : vector<1x128x128xbf16> to vector<128x128xbf16>
    %20 = arith.truncf %5 : vector<128x128xf32> to vector<128x128xbf16>
    %cst = arith.constant dense<0.000000e+00> : vector<128x128xf32>
    %21 = tpu.matmul %19, %20, %cst {dimension_numbers = #tpu.dot_dimension_numbers<[1], [0], [0], [1], [0, 0, 1, 1], [], []>} : vector<128x128xbf16>, vector<128x128xbf16>, vector<128x128xf32> -> vector<128x128xf32>
    %c0_13 = arith.constant 0 : index
    %c0_14 = arith.constant 0 : index
    %c0_15 = arith.constant 0 : index
    %22 = vector.load %arg4[%c0_13, %c0_14, %c0_15] : memref<2x128x128xf32, #tpu.memory_space<vmem>>, vector<1x128x128xf32>
    %23 = vector.shape_cast %22 : vector<1x128x128xf32> to vector<128x128xf32>
    %c0_16 = arith.constant 0 : index
    %c1_17 = arith.constant 1 : index
    %24 = memref.load %arg3[%c0_16, %c1_17] : memref<2x5xf32, #tpu.memory_space<smem>>
    %25 = vector.broadcast %24 : f32 to vector<128x128xf32>
    %26 = arith.mulf %25, %21 : vector<128x128xf32>
    %27 = arith.addf %23, %26 : vector<128x128xf32>
    %c0_18 = arith.constant 0 : index
    %c0_19 = arith.constant 0 : index
    %c0_20 = arith.constant 0 : index
    %28 = vector.load %arg4[%c0_18, %c0_19, %c0_20] : memref<2x128x128xf32, #tpu.memory_space<vmem>>, vector<1x128x128xf32>
    %29 = vector.shape_cast %28 : vector<1x128x128xf32> to vector<128x128xf32>
    %30 = vector.shape_cast %27 : vector<128x128xf32> to vector<1x128x128xf32>
    tpu.vector_store %arg4[%c0_18, %c0_19, %c0_20], %30 {strides = array<i32>} : memref<2x128x128xf32, #tpu.memory_space<vmem>>, vector<1x128x128xf32>,
    %c1_21 = arith.constant 1 : index
    %c0_22 = arith.constant 0 : index
    %c0_23 = arith.constant 0 : index
    %31 = vector.load %arg4[%c1_21, %c0_22, %c0_23] : memref<2x128x128xf32, #tpu.memory_space<vmem>>, vector<1x128x128xf32>
    %32 = vector.shape_cast %31 : vector<1x128x128xf32> to vector<128x128xf32>
    %c1_24 = arith.constant 1 : index
    %c1_25 = arith.constant 1 : index
    %33 = memref.load %arg3[%c1_24, %c1_25] : memref<2x5xf32, #tpu.memory_space<smem>>
    %34 = vector.broadcast %33 : f32 to vector<128x128xf32>
    %35 = arith.mulf %34, %21 : vector<128x128xf32>
    %36 = arith.addf %32, %35 : vector<128x128xf32>
    %c1_26 = arith.constant 1 : index
    %c0_27 = arith.constant 0 : index
    %c0_28 = arith.constant 0 : index
    %37 = vector.load %arg4[%c1_26, %c0_27, %c0_28] : memref<2x128x128xf32, #tpu.memory_space<vmem>>, vector<1x128x128xf32>
    %38 = vector.shape_cast %37 : vector<1x128x128xf32> to vector<128x128xf32>
    %39 = vector.shape_cast %36 : vector<128x128xf32> to vector<1x128x128xf32>
    tpu.vector_store %arg4[%c1_26, %c0_27, %c0_28], %39 {strides = array<i32>} : memref<2x128x128xf32, #tpu.memory_space<vmem>>, vector<1x128x128xf32>,
    %c1_29 = arith.constant 1 : index
    %c0_30 = arith.constant 0 : index
    %c0_31 = arith.constant 0 : index
    %40 = vector.load %arg2[%c1_29, %c0_30, %c0_31] : memref<4x128x128xbf16, #tpu.memory_space<vmem>>, vector<1x128x128xbf16>
    %41 = vector.shape_cast %40 : vector<1x128x128xbf16> to vector<128x128xbf16>
    %42 = arith.truncf %21 : vector<128x128xf32> to vector<128x128xbf16>
    %cst_32 = arith.constant dense<0.000000e+00> : vector<128x128xf32>
    %43 = tpu.matmul %41, %42, %cst_32 {dimension_numbers = #tpu.dot_dimension_numbers<[1], [0], [0], [1], [0, 0, 1, 1], [], []>} : vector<128x128xbf16>, vector<128x128xbf16>, vector<128x128xf32> -> vector<128x128xf32>
    %c0_33 = arith.constant 0 : index
    %c0_34 = arith.constant 0 : index
    %c0_35 = arith.constant 0 : index
    %44 = vector.load %arg4[%c0_33, %c0_34, %c0_35] : memref<2x128x128xf32, #tpu.memory_space<vmem>>, vector<1x128x128xf32>
    %45 = vector.shape_cast %44 : vector<1x128x128xf32> to vector<128x128xf32>
    %c0_36 = arith.constant 0 : index
    %c2 = arith.constant 2 : index
    %46 = memref.load %arg3[%c0_36, %c2] : memref<2x5xf32, #tpu.memory_space<smem>>
    %47 = vector.broadcast %46 : f32 to vector<128x128xf32>
    %48 = arith.mulf %47, %43 : vector<128x128xf32>
    %49 = arith.addf %45, %48 : vector<128x128xf32>
    %c0_37 = arith.constant 0 : index
    %c0_38 = arith.constant 0 : index
    %c0_39 = arith.constant 0 : index
    %50 = vector.load %arg4[%c0_37, %c0_38, %c0_39] : memref<2x128x128xf32, #tpu.memory_space<vmem>>, vector<1x128x128xf32>
    %51 = vector.shape_cast %50 : vector<1x128x128xf32> to vector<128x128xf32>
    %52 = vector.shape_cast %49 : vector<128x128xf32> to vector<1x128x128xf32>
    tpu.vector_store %arg4[%c0_37, %c0_38, %c0_39], %52 {strides = array<i32>} : memref<2x128x128xf32, #tpu.memory_space<vmem>>, vector<1x128x128xf32>,
    %c1_40 = arith.constant 1 : index
    %c0_41 = arith.constant 0 : index
    %c0_42 = arith.constant 0 : index
    %53 = vector.load %arg4[%c1_40, %c0_41, %c0_42] : memref<2x128x128xf32, #tpu.memory_space<vmem>>, vector<1x128x128xf32>
    %54 = vector.shape_cast %53 : vector<1x128x128xf32> to vector<128x128xf32>
    %c1_43 = arith.constant 1 : index
    %c2_44 = arith.constant 2 : index
    %55 = memref.load %arg3[%c1_43, %c2_44] : memref<2x5xf32, #tpu.memory_space<smem>>
    %56 = vector.broadcast %55 : f32 to vector<128x128xf32>
    %57 = arith.mulf %56, %43 : vector<128x128xf32>
    %58 = arith.addf %54, %57 : vector<128x128xf32>
    %c1_45 = arith.constant 1 : index
    %c0_46 = arith.constant 0 : index
    %c0_47 = arith.constant 0 : index
    %59 = vector.load %arg4[%c1_45, %c0_46, %c0_47] : memref<2x128x128xf32, #tpu.memory_space<vmem>>, vector<1x128x128xf32>
    %60 = vector.shape_cast %59 : vector<1x128x128xf32> to vector<128x128xf32>
    %61 = vector.shape_cast %58 : vector<128x128xf32> to vector<1x128x128xf32>
    tpu.vector_store %arg4[%c1_45, %c0_46, %c0_47], %61 {strides = array<i32>} : memref<2x128x128xf32, #tpu.memory_space<vmem>>, vector<1x128x128xf32>,
    %c2_48 = arith.constant 2 : index
    %c0_49 = arith.constant 0 : index
    %c0_50 = arith.constant 0 : index
    %62 = vector.load %arg2[%c2_48, %c0_49, %c0_50] : memref<4x128x128xbf16, #tpu.memory_space<vmem>>, vector<1x128x128xbf16>
    %63 = vector.shape_cast %62 : vector<1x128x128xbf16> to vector<128x128xbf16>
    %64 = arith.truncf %43 : vector<128x128xf32> to vector<128x128xbf16>
    %cst_51 = arith.constant dense<0.000000e+00> : vector<128x128xf32>
    %65 = tpu.matmul %63, %64, %cst_51 {dimension_numbers = #tpu.dot_dimension_numbers<[1], [0], [0], [1], [0, 0, 1, 1], [], []>} : vector<128x128xbf16>, vector<128x128xbf16>, vector<128x128xf32> -> vector<128x128xf32>
    %c0_52 = arith.constant 0 : index
    %c0_53 = arith.constant 0 : index
    %c0_54 = arith.constant 0 : index
    %66 = vector.load %arg4[%c0_52, %c0_53, %c0_54] : memref<2x128x128xf32, #tpu.memory_space<vmem>>, vector<1x128x128xf32>
    %67 = vector.shape_cast %66 : vector<1x128x128xf32> to vector<128x128xf32>
    %c0_55 = arith.constant 0 : index
    %c3 = arith.constant 3 : index
    %68 = memref.load %arg3[%c0_55, %c3] : memref<2x5xf32, #tpu.memory_space<smem>>
    %69 = vector.broadcast %68 : f32 to vector<128x128xf32>
    %70 = arith.mulf %69, %65 : vector<128x128xf32>
    %71 = arith.addf %67, %70 : vector<128x128xf32>
    %c0_56 = arith.constant 0 : index
    %c0_57 = arith.constant 0 : index
    %c0_58 = arith.constant 0 : index
    %72 = vector.load %arg4[%c0_56, %c0_57, %c0_58] : memref<2x128x128xf32, #tpu.memory_space<vmem>>, vector<1x128x128xf32>
    %73 = vector.shape_cast %72 : vector<1x128x128xf32> to vector<128x128xf32>
    %74 = vector.shape_cast %71 : vector<128x128xf32> to vector<1x128x128xf32>
    tpu.vector_store %arg4[%c0_56, %c0_57, %c0_58], %74 {strides = array<i32>} : memref<2x128x128xf32, #tpu.memory_space<vmem>>, vector<1x128x128xf32>,
    %c1_59 = arith.constant 1 : index
    %c0_60 = arith.constant 0 : index
    %c0_61 = arith.constant 0 : index
    %75 = vector.load %arg4[%c1_59, %c0_60, %c0_61] : memref<2x128x128xf32, #tpu.memory_space<vmem>>, vector<1x128x128xf32>
    %76 = vector.shape_cast %75 : vector<1x128x128xf32> to vector<128x128xf32>
    %c1_62 = arith.constant 1 : index
    %c3_63 = arith.constant 3 : index
    %77 = memref.load %arg3[%c1_62, %c3_63] : memref<2x5xf32, #tpu.memory_space<smem>>
    %78 = vector.broadcast %77 : f32 to vector<128x128xf32>
    %79 = arith.mulf %78, %65 : vector<128x128xf32>
    %80 = arith.addf %76, %79 : vector<128x128xf32>
    %c1_64 = arith.constant 1 : index
    %c0_65 = arith.constant 0 : index
    %c0_66 = arith.constant 0 : index
    %81 = vector.load %arg4[%c1_64, %c0_65, %c0_66] : memref<2x128x128xf32, #tpu.memory_space<vmem>>, vector<1x128x128xf32>
    %82 = vector.shape_cast %81 : vector<1x128x128xf32> to vector<128x128xf32>
    %83 = vector.shape_cast %80 : vector<128x128xf32> to vector<1x128x128xf32>
    tpu.vector_store %arg4[%c1_64, %c0_65, %c0_66], %83 {strides = array<i32>} : memref<2x128x128xf32, #tpu.memory_space<vmem>>, vector<1x128x128xf32>,
    %c3_67 = arith.constant 3 : index
    %c0_68 = arith.constant 0 : index
    %c0_69 = arith.constant 0 : index
    %84 = vector.load %arg2[%c3_67, %c0_68, %c0_69] : memref<4x128x128xbf16, #tpu.memory_space<vmem>>, vector<1x128x128xbf16>
    %85 = vector.shape_cast %84 : vector<1x128x128xbf16> to vector<128x128xbf16>
    %86 = arith.truncf %65 : vector<128x128xf32> to vector<128x128xbf16>
    %cst_70 = arith.constant dense<0.000000e+00> : vector<128x128xf32>
    %87 = tpu.matmul %85, %86, %cst_70 {dimension_numbers = #tpu.dot_dimension_numbers<[1], [0], [0], [1], [0, 0, 1, 1], [], []>} : vector<128x128xbf16>, vector<128x128xbf16>, vector<128x128xf32> -> vector<128x128xf32>
    %c0_71 = arith.constant 0 : index
    %c0_72 = arith.constant 0 : index
    %c0_73 = arith.constant 0 : index
    %88 = vector.load %arg4[%c0_71, %c0_72, %c0_73] : memref<2x128x128xf32, #tpu.memory_space<vmem>>, vector<1x128x128xf32>
    %89 = vector.shape_cast %88 : vector<1x128x128xf32> to vector<128x128xf32>
    %c0_74 = arith.constant 0 : index
    %c4 = arith.constant 4 : index
    %90 = memref.load %arg3[%c0_74, %c4] : memref<2x5xf32, #tpu.memory_space<smem>>
    %91 = vector.broadcast %90 : f32 to vector<128x128xf32>
    %92 = arith.mulf %91, %87 : vector<128x128xf32>
    %93 = arith.addf %89, %92 : vector<128x128xf32>
    %c0_75 = arith.constant 0 : index
    %c0_76 = arith.constant 0 : index
    %c0_77 = arith.constant 0 : index
    %94 = vector.load %arg4[%c0_75, %c0_76, %c0_77] : memref<2x128x128xf32, #tpu.memory_space<vmem>>, vector<1x128x128xf32>
    %95 = vector.shape_cast %94 : vector<1x128x128xf32> to vector<128x128xf32>
    %96 = vector.shape_cast %93 : vector<128x128xf32> to vector<1x128x128xf32>
    tpu.vector_store %arg4[%c0_75, %c0_76, %c0_77], %96 {strides = array<i32>} : memref<2x128x128xf32, #tpu.memory_space<vmem>>, vector<1x128x128xf32>,
    %c1_78 = arith.constant 1 : index
    %c0_79 = arith.constant 0 : index
    %c0_80 = arith.constant 0 : index
    %97 = vector.load %arg4[%c1_78, %c0_79, %c0_80] : memref<2x128x128xf32, #tpu.memory_space<vmem>>, vector<1x128x128xf32>
    %98 = vector.shape_cast %97 : vector<1x128x128xf32> to vector<128x128xf32>
    %c1_81 = arith.constant 1 : index
    %c4_82 = arith.constant 4 : index
    %99 = memref.load %arg3[%c1_81, %c4_82] : memref<2x5xf32, #tpu.memory_space<smem>>
    %100 = vector.broadcast %99 : f32 to vector<128x128xf32>
    %101 = arith.mulf %100, %87 : vector<128x128xf32>
    %102 = arith.addf %98, %101 : vector<128x128xf32>
    %c1_83 = arith.constant 1 : index
    %c0_84 = arith.constant 0 : index
    %c0_85 = arith.constant 0 : index
    %103 = vector.load %arg4[%c1_83, %c0_84, %c0_85] : memref<2x128x128xf32, #tpu.memory_space<vmem>>, vector<1x128x128xf32>
    %104 = vector.shape_cast %103 : vector<1x128x128xf32> to vector<128x128xf32>
    %105 = vector.shape_cast %102 : vector<128x128xf32> to vector<1x128x128xf32>
    tpu.vector_store %arg4[%c1_83, %c0_84, %c0_85], %105 {strides = array<i32>} : memref<2x128x128xf32, #tpu.memory_space<vmem>>, vector<1x128x128xf32>,
    return
  }
  func.func @transform_0(%arg0: i32) -> (i32, i32) {
    %c0_i32 = arith.constant 0 : i32
    %c0_i32_0 = arith.constant 0 : i32
    return %c0_i32, %arg0 : i32, i32
  }
  func.func @transform_1(%arg0: i32) -> (i32, i32, i32) {
    %c0_i32 = arith.constant 0 : i32
    %c0_i32_0 = arith.constant 0 : i32
    %c0_i32_1 = arith.constant 0 : i32
    %c0_i32_2 = arith.constant 0 : i32
    return %c0_i32, %c0_i32_0, %c0_i32_1 : i32, i32, i32
  }
  func.func @transform_2(%arg0: i32) -> (i32, i32) {
    %c0_i32 = arith.constant 0 : i32
    %c0_i32_0 = arith.constant 0 : i32
    %c0_i32_1 = arith.constant 0 : i32
    return %c0_i32, %c0_i32_0 : i32, i32
  }
  func.func @transform_3(%arg0: i32) -> (i32, i32, i32) {
    %c0_i32 = arith.constant 0 : i32
    %c0_i32_0 = arith.constant 0 : i32
    %c0_i32_1 = arith.constant 0 : i32
    return %c0_i32, %c0_i32_0, %arg0 : i32, i32, i32
  }
}

</mosaic_0001>

<bundles_post_ra>
// kernel: tpu_custom_call.1
= control target key start
LH: loop header
LB: loop body
LE: loop exit
PB: predicated region body
PF: predicated region fallthrough
CT: control target
= control target key end

     0   :  { %8 = vsyncpa [#allocation3], 0  ;;  %s3287_s0 = inlined_call_operand.hbm [shape: s32[1,256], index: 0, kind: input, shape index: {}]   ;;  %s3288_s1 = inlined_call_operand.hbm [shape: bf16[4,128,128], index: 1, kind: input, shape index: {}]   ;;  %s3289_s2 = inlined_call_operand.vmem [shape: f32[2,5], index: 2, kind: input, shape index: {}]   ;;  %s3290_s3 = inlined_call_operand.hbm [shape: f32[2,128,256], index: 3, kind: output, shape index: {}]  }
   0x1   :  { %10 = vsyncpa [#allocation3 + $0x1], 0 }
   0x2   :  { %11 = vsyncpa [#allocation7], 0 }
   0x3   :  { %12 = vsyncpa [#allocation5], 0 }
   0x4   :  { %13 = vsyncpa [#allocation4], 0 }
   0x5   :  { %15 = vsyncpa [#allocation4 + $0x1], 0  ;;  %s2374_s12 = smov 0   ;;  %s2376_s13 = smov 0  }
   0x6   :  { %s2378_s14 = smov 0   ;;  %s2380_s15 = smov 0  }
   0x7 LB: > { %s2395_s16 = sadd.s32 4294967295, %s2341_s15   ;;  %s1664_s17 = sadd.s32 4294967294, %s2341_s15   ;;  %s2341_s15 = sphi %s2380_s15, %s3320_s15   ;;  %s2337_s14 = sphi %s2378_s14, %s3319_s14   ;;  %s2333_s13 = sphi %s2376_s13, %s3318_s13   ;;  %s2329_s12 = sphi %s2374_s12, %s3317_s12  }
   0x8   : > { %p41_p0 = scmp.ne.s32.totalorder %s2333_s13, %s2329_s12  ;;  %p3291_p1 = scmp.eq.s32.totalorder %s2395_s16, 0 }
   0x9   : > { %p113_p3 = scmp.eq.s32.totalorder %s1664_s17, 1  ;;  %p1665_p5 = scmp.ge.s32.totalorder %s2341_s15, 1 }
   0xa   : > { %p2404_p4 = por %p3291_p1, %p41_p0  ;;  %p120_p7 = scmp.lt.s32.totalorder %s2341_s15, 3 }
   0xb   : > { %p2409_p6 = por %p113_p3, %p41_p0  ;;  %s2343_s21 = smov [#allocation6]  }
   0xc   : > { %s3298_s18 = scalar_select %p2404_p4, 1, 0 }
   0xd   : > { %s3299_s19 = scalar_select %p2409_p6, 1, 0 }
   0xe   : > { %p2414_p8 = pnand %p1665_p5, %p120_p7  ;;  %s132_s22 = sshll.u32 %s2343_s21, 4  ;;  %s133_s22 = int_to_ptr.vmem [resolvable:$true] %s132_s22 }
   0xf   : > { %s146_s25 = sshll.u32 %s3289_s2, 4  ;;  %s2194_s29 = scalar_lea.hbm %s3288_s1, 4096  ;;  %s2430_s25 = int_to_ptr.vmem [resolvable:$true] %s146_s25 }
  0x10   : > { %s3300_s20 = scalar_select %p2414_p8, 1, 0 }
  0x11   : > { %p2100_p9 = pneg %p2414_p8  ;;  %p2195_p12 = scmp.ne.s32.totalorder %s3288_s1, %s2194_s29 }
  0x12   : > { %p2201_p5 = scmp.lt.u32.totalorder %s2194_s29, %s3288_s1 }
  0x13   : > { %p2426_p11 = pnand %p2100_p9, %p3291_p1 }
  0x15   : > { %p2196_p13 = pneg %p2426_p11 }
  0x17   : > { %p2197_p0 = pnand %p2196_p13, %p2195_p12 }
  0x19   : > { %p2198_p3 = pneg %p2197_p0 }
  0x1b   : > { %p2203_p7 = pnand %p2201_p5, %p2198_p3 }
  0x1d   : > { %2206 = shalt.err (!%p2203_p7)
}
  0x1e   : > { %s2207_s7 = scalar_lea.vmem %s133_s22, 4096  ;;  %p2215_p2 = scmp.lt.s32.totalorder %s133_s22, %s133_s22 }
  0x1f   : > { %p2208_p9 = scmp.ne.s32.totalorder %s133_s22, %s2207_s7  ;;  %p2216_p6 = scmp.lt.s32.totalorder %s2207_s7, %s2207_s7 }
  0x21   : > { %p2210_p10 = pnand %p2208_p9, %p2196_p13  ;;  %p2217_p4 = por %p2216_p6, %p2215_p2 }
  0x23   : > { %p2211_p1 = pneg %p2210_p10 }
  0x25   : > { %p2218_p8 = pnand %p2217_p4, %p2211_p1 }
  0x27   : > { %2221 = shalt.err (!%p2218_p8)
}
  0x28   : > { %s2344_s8 = smov 64   ;;  %s2345_s9 = smov 4  }
  0x29   : > { %2103 = dma.hbm_to_vmem [thread:$0]  (!%p2426_p11), %s3288_s1, 4096, %s133_s22, [#allocation7], %s2344_s8, %s2344_s8, %s2345_s9  }
  0x2a   : > { %s2222_s17 = scalar_lea.vmem %s2430_s25, 32  ;;  %p2230_p1 = scmp.lt.s32.totalorder %s2430_s25, %s2430_s25 }
  0x2b   : > { %p2223_p12 = scmp.ne.s32.totalorder %s2430_s25, %s2222_s17  ;;  %p2231_p4 = scmp.lt.s32.totalorder %s2222_s17, %s2222_s17 }
  0x2d   : > { %p2225_p10 = pnand %p2223_p12, %p2196_p13  ;;  %p2232_p6 = por %p2231_p4, %p2230_p1 }
  0x2f   : > { %p2226_p2 = pneg %p2225_p10 }
  0x31   : > { %p2233_p8 = pnand %p2232_p6, %p2226_p2 }
  0x33   : > { %2236 = shalt.err (!%p2233_p8)
}
  0x34   : > { %s2346_s21 = smov [#allocation8]   ;;  %s2465_s22 = sadd.s32 1, %s2341_s15  }
  0x35   : > { %2106 = dma.vmem_to_smem (!%p2426_p11), %s2430_s25, 32, %s2346_s21, [#allocation5]  }
  0x36   : > { %s28_s23 = sadd.s32 1, %s2337_s14  ;;  %s25_s24 = ssub.s32 %s2341_s15, %s2465_s22 }
  0x37   : > { %p35_p13 = scmp.ne.s32.totalorder %s2337_s14, %s2333_s13  ;;  %p26_p0 = scmp.eq.s32.totalorder %s25_s24, 0 }
  0x38   : > { %p36_p3 = scmp.eq.s32.totalorder %s2341_s15, 0  ;;  %p3302_p5 = scmp.eq.s32.totalorder %s2395_s16, 1 }
  0x39   : > { %p2117_p9 = scmp.lt.s32.totalorder %s2341_s15, 2  ;;  %s157_s28 = sand.u32 1, %s2337_s14  }
  0x3a   : > { %p2475_p7 = por %p3302_p5, %p35_p13  ;;  %p37_p12 = por %p36_p3, %p35_p13 }
  0x3b   : > { %s2481_s27 = scalar_select %p26_p0, %s2337_s14, %s28_s23  }
  0x3c   : > { %s1669_s29 = sshll.u32 %s2341_s15, 4  ;;  %s160_s25 = scalar_lea.vmem [#allocation2], %s157_s28 }
  0x3d   : > { %s167_s30 = sshll.u32 %s160_s25, 4  ;;  %s2488_s6 = scalar_lea.hbm %s3287_s0, %s1669_s29  ;;  %s2490_s30 = int_to_ptr.vmem [resolvable:$true] %s167_s30 }
  0x3e   : > { %p2492_p11 = pnand %p2117_p9, %p37_p12  ;;  %s158_s8 = scalar_lea.sflag [#allocation3], %s157_s28 }
  0x3f   : > { %s2237_s9 = scalar_lea.hbm %s2488_s6, 16  ;;  %s2242_s17 = scalar_lea.hbm %s3287_s0, 32 }
  0x40   : > { %p2238_p10 = scmp.ne.s32.totalorder %s2488_s6, %s2237_s9  ;;  %p2239_p2 = pneg %p2492_p11 }
  0x41   : > { %p2243_p6 = scmp.lt.u32.totalorder %s2488_s6, %s3287_s0  ;;  %p2244_p8 = scmp.lt.u32.totalorder %s2242_s17, %s2237_s9 }
  0x42   : > { %p2240_p1 = pnand %p2239_p2, %p2238_p10  ;;  %p2246_p0 = scmp.lt.u32.totalorder %s2237_s9, %s2488_s6 }
  0x43   : > { %p2245_p13 = por %p2244_p8, %p2243_p6 }
  0x44   : > { %p2241_p4 = pneg %p2240_p1 }
  0x45   : > { %p2247_p3 = por %p2246_p0, %p2245_p13 }
  0x47   : > { %p2248_p5 = pnand %p2247_p3, %p2241_p4 }
  0x49   : > { %2251 = shalt.err (!%p2248_p5)
}
  0x4a   : > { %s2252_s24 = scalar_lea.vmem %s2490_s30, 16  ;;  %s2347_s28 = smov [#allocation2]  }
  0x4b   : > { %p2253_p9 = scmp.ne.s32.totalorder %s2490_s30, %s2252_s24  ;;  %s2257_s29 = sshll.u32 %s2347_s28, 4  ;;  %s2258_s29 = int_to_ptr.vmem [resolvable:$false] %s2257_s29 }
  0x4c   : > { %s2259_s25 = scalar_lea.vmem %s2258_s29, 32  ;;  %p2260_p1 = scmp.lt.s32.totalorder %s2490_s30, %s2258_s29 }
  0x4d   : > { %p2255_p12 = pnand %p2253_p9, %p2239_p2  ;;  %p2261_p6 = scmp.lt.s32.totalorder %s2259_s25, %s2252_s24 }
  0x4f   : > { %p2256_p10 = pneg %p2255_p12  ;;  %p2262_p8 = por %p2261_p6, %p2260_p1 }
  0x51   : > { %p2263_p13 = pnand %p2262_p8, %p2256_p10 }
  0x53   : > { %2266 = shalt.err (!%p2263_p13)
}
  0x54   : > { %2110 = dma.hbm_to_vmem [thread:$0]  (!%p2492_p11), %s2488_s6, 16, %s2490_s30, %s158_s8  }
  0x55   : > { %p3305_p4 = scmp.ne.s32.totalorder %s3300_s20, 0 }
  0x56   : > { %s2524_s4 = sand.u32 (!%p3305_p4), 1, %s2333_s13   ;;  %p3306_p2 = scmp.ne.s32.totalorder (!%p3305_p4), %s3298_s18, 0 }
  0x57   : > { %176 = sbr.rel (%p3305_p4) target bundleno = 1153 (0x481), region = 32  ;;  %s179_s5 = scalar_lea.sflag (!%p3305_p4), [#allocation3], %s2524_s4 }
  0x58   : > { %s181_s9 = scalar_lea.vmem (!%p3305_p4), [#allocation2], %s2524_s4 }
  0x5e   : > { %2312 = dma.done.wait (%p3306_p2), %s179_s5, 16  }
  0x5f   : > { %2314 = vsyncadd (%p3306_p2), %s179_s5, 4294967280  ;;  %p3307_p0 = scmp.eq.s32.totalorder %s2395_s16, 0 }
  0x61   : > { %2316 = dma.done.wait (%p3307_p0), [#allocation7], 4096   ;;  %p3308_p11 = pmov %p3307_p0 }
  0x62   : > { %p3309_p3 = pmov %p3307_p0 }
  0x63   : > { %2318 = vsyncadd (%p3308_p11), [#allocation7], 4294963200 }
  0x64   : > { %2320 = dma.done.wait (%p3309_p3), [#allocation5], 32   ;;  %p3310_p5 = pmov %p3307_p0 }
  0x66   : > { %2322 = vsyncadd (%p3310_p5), [#allocation5], 4294967264 }
  0x67   : > { %194 = sfence }
  0x68   : > { %v214_v0 = vlaneseq  ;;  %v2540_v1 = vld [vmem:[%s181_s9] ss:$0 sm:$0xff]  ;;  %v2162_v2 = vld [vmem:[#allocation6] sm:$0xff]   ;;  %v2348_v9 = vmov 1.0|1.0   ;;  %v2163_v20 = vld [vmem:[#allocation6 + $0x8] sm:$0xff]  }
  0x69   : > { %1976 = vmatprep.mubr.bf16.mxu0 %v2162_v2  ;;  %v2164_v21 = vld [vmem:[#allocation6 + $0x10] sm:$0xff]   ;;  %v2165_v22 = vld [vmem:[#allocation6 + $0x18] sm:$0xff]   ;;  %v2166_v23 = vld [vmem:[#allocation6 + $0x20] sm:$0xff]   ;;  %s283_s18 = sld [smem:[#allocation8]]  ;;  %s1732_s30 = sld [smem:[#allocation8 + $0x1]]  ;;  %v2349_v28 = vmov 0.0  }
  0x6a   : > { %v2542_v3 = vshrl.u32 %v214_v0, 7  ;;  %v2167_v24 = vld [vmem:[#allocation6 + $0x28] sm:$0xff]   ;;  %v2168_v25 = vld [vmem:[#allocation6 + $0x30] sm:$0xff]   ;;  %v2169_v26 = vld [vmem:[#allocation6 + $0x38] sm:$0xff]   ;;  %s1691_s20 = sld [smem:[#allocation8 + $0x80]]  ;;  %s1749_s6 = sld [smem:[#allocation8 + $0x81]] }
  0x6b   : > { %v2170_v27 = vld [vmem:[#allocation6 + $0x40] sm:$0xff]   ;;  %s1774_s7 = sld [smem:[#allocation8 + $0x2]]  ;;  %s1816_s10 = sld [smem:[#allocation8 + $0x3]] }
  0x6c   : > { %v2545_v4 = vadd.s32 8, %v2542_v3  ;;  %vm235_vm0 = vcmp.eq.s32.totalorder %v2542_v3, %v2540_v1  ;;  %v2550_v5 = vadd.s32 16, %v2542_v3  ;;  %v2553_v6 = vadd.s32 24, %v2542_v3  ;;  %2008 = vmatprep.mubr.bf16.mxu1 %v2170_v27  ;;  %s1791_s8 = sld [smem:[#allocation8 + $0x82]]  ;;  %s1833_s11 = sld [smem:[#allocation8 + $0x83]] }
  0x6d   : > { %v2556_v7 = vadd.s32 32, %v2542_v3  ;;  %v2565_v8 = vadd.s32 40, %v2542_v3  ;;  %v2580_v10 = vadd.s32 48, %v2542_v3  ;;  %v2587_v11 = vadd.s32 56, %v2542_v3  ;;  %s1858_s17 = sld [smem:[#allocation8 + $0x4]]  ;;  %s1673_s23 = sshll.u32 %s2524_s4, 8 }
  0x6e   : > { %vm236_vm1 = vcmp.eq.s32.totalorder %v2545_v4, %v2540_v1  ;;  %vm237_vm2 = vcmp.eq.s32.totalorder %v2550_v5, %v2540_v1  ;;  %vm238_vm3 = vcmp.eq.s32.totalorder %v2553_v6, %v2540_v1  ;;  %v2596_v12 = vadd.s32 64, %v2542_v3  ;;  %s1875_s21 = sld [smem:[#allocation8 + $0x84]]  ;;  %s3150_s24 = scalar_lea.vmem [#allocation9], %s1673_s23 }
  0x6f   : > { %vm1716_vm4 = vmpackc.low %vm236_vm1, %vm235_vm0  ;;  %vm239_vm6 = vcmp.eq.s32.totalorder %v2556_v7, %v2540_v1  ;;  %vm240_vm7 = vcmp.eq.s32.totalorder %v2565_v8, %v2540_v1  ;;  %vm241_vm9 = vcmp.eq.s32.totalorder %v2580_v10, %v2540_v1  ;;  %vm3296_vm10 = vcmp.eq.s32.totalorder %v2587_v11, %v2540_v1  ;;  %s1893_s28 = sshll.u32 %s2395_s16, 7  ;;  %s1572_s29 = sshll.u32 %s3150_s24, 4  ;;  %s3235_s29 = int_to_ptr.vmem [resolvable:$true] %s1572_s29 }
  0x70   : > { %1960 = vmatprep.subr.msk.bf16.mxu0 %vm1716_vm4, %v2348_v9  ;;  %vm1718_vm5 = vmpackc.low %vm238_vm3, %vm237_vm2  ;;  %v2603_v13 = vadd.s32 72, %v2542_v3  ;;  %v2606_v14 = vadd.s32 80, %v2542_v3  ;;  %v2609_v15 = vadd.s32 88, %v2542_v3  ;;  %vm3295_vm12 = vcmp.eq.s32.totalorder %v2596_v12, %v2540_v1  ;;  %s3229_s5 = scalar_lea.hbm %s3290_s3, %s1893_s28  ;;  %s1560_s9 = scalar_lea.sflag [#allocation4], %s2524_s4 }
  0x71   : > { %1961 = vmatpush3.bf16.msk.msra.mxu0 %vm1716_vm4, %v2348_v9  ;;  %vm1720_vm8 = vmpackc.low %vm240_vm7, %vm239_vm6  ;;  %v2626_v16 = vadd.s32 96, %v2542_v3  ;;  %v2635_v17 = vadd.s32 104, %v2542_v3  ;;  %v2638_v18 = vadd.s32 112, %v2542_v3  ;;  %v2643_v19 = vadd.s32 120, %v2542_v3 }
  0x72   : > { %1962 = vmatprep.subr.msk.bf16.mxu0 %vm1718_vm5, %v2348_v9  ;;  %vm1722_vm11 = vmpackc.low %vm3296_vm10, %vm241_vm9  ;;  %vm3294_vm13 = vcmp.eq.s32.totalorder %v2603_v13, %v2540_v1  ;;  %vm245_vm14 = vcmp.eq.s32.totalorder %v2606_v14, %v2540_v1  ;;  %vm3297_vm15 = vcmp.eq.s32.totalorder %v2609_v15, %v2540_v1  ;;  %v1675_v29 = vsel %vm235_vm0, 1.0, %v2349_v28 }
  0x73   : > { %vm1724_vm4 = vmpackc.low %vm3294_vm13, %vm3295_vm12  ;;  %vm248_vm13 = vcmp.eq.s32.totalorder %v2635_v17, %v2540_v1  ;;  %vm249_vm12 = vcmp.eq.s32.totalorder %v2638_v18, %v2540_v1  ;;  %vm250_vm10 = vcmp.eq.s32.totalorder %v2643_v19, %v2540_v1  ;;  %v1676_v30 = vsel %vm236_vm1, 1.0, %v2349_v28 }
  0x74   : > { %v2677_v31 = vstv %s283_s18  ;;  %v2679_v32 = vstv %s1691_s20  ;;  %v1677_v33 = vsel %vm237_vm2, 1.0, %v2349_v28  ;;  %v1678_v34 = vsel %vm238_vm3, 1.0, %v2349_v28  ;;  %s2267_s18 = scalar_lea.vmem %s3235_s29, 4096  ;;  %s2350_s20 = smov [#allocation9]  }
  0x75   : > { %1963 = vmatpush3.bf16.msk.msra.mxu0 %vm1718_vm5, %v2348_v9  ;;  %vm247_vm5 = vcmp.eq.s32.totalorder %v2626_v16, %v2540_v1  ;;  %v2689_v35 = vstv %s1732_s30  ;;  %v2691_v36 = vstv %s1749_s6  ;;  %v285_v37 = vmul.f32 %v1675_v29, %v2677_v31  ;;  %p2268_p9 = scmp.ne.s32.totalorder %s3235_s29, %s2267_s18  ;;  %s2271_s30 = sshll.u32 %s2350_s20, 4  ;;  %s2272_s30 = int_to_ptr.vmem [resolvable:$false] %s2271_s30 }
  0x76   : > { %1964 = vmatprep.subr.msk.bf16.mxu0 %vm1720_vm8, %v2348_v9  ;;  %v286_v38 = vmul.f32 %v1676_v30, %v2677_v31  ;;  %v287_v39 = vmul.f32 %v1677_v33, %v2677_v31  ;;  %v321_v40 = vmul.f32 %v1677_v33, %v2679_v32  ;;  %v319_v41 = vmul.f32 %v1675_v29, %v2679_v32  ;;  %s2273_s6 = scalar_lea.vmem %s2272_s30, 8192  ;;  %p2274_p1 = scmp.lt.s32.totalorder %s3235_s29, %s2272_s30 }
  0x77   : > { %v320_v42 = vmul.f32 %v1676_v30, %v2679_v32  ;;  %v288_v43 = vmul.f32 %v1678_v34, %v2677_v31  ;;  %v322_v44 = vmul.f32 %v1678_v34, %v2679_v32  ;;  %v1679_v46 = vsel %vm239_vm6, 1.0, %v2349_v28  ;;  %p2269_p12 = pnand %p2268_p9, %p2475_p7  ;;  %p2275_p6 = scmp.lt.s32.totalorder %s2273_s6, %s2267_s18 }
  0x78   : > { %v1680_v47 = vsel %vm240_vm7, 1.0, %v2349_v28  ;;  %v1681_v51 = vsel %vm241_vm9, 1.0, %v2349_v28  ;;  %vm3311_vm0 = vcmp.eq.s32.totalorder %v2587_v11, %v2540_v1  ;;  %v289_v7 = vmul.f32 %v1679_v46, %v2677_v31 }
  0x79   : > { %1965 = vmatpush3.bf16.msk.msra.mxu0 %vm1720_vm8, %v2348_v9  ;;  %vm1726_vm8 = vmpackc.low %vm3297_vm15, %vm245_vm14  ;;  %v1682_v52 = vsel %vm3311_vm0, 1.0, %v2349_v28  ;;  %v291_v8 = vmul.f32 %v1681_v51, %v2677_v31  ;;  %v290_v11 = vmul.f32 %v1680_v47, %v2677_v31  ;;  %vm3312_vm1 = vcmp.eq.s32.totalorder %v2596_v12, %v2540_v1  ;;  %p2270_p10 = pneg %p2269_p12  ;;  %p2276_p8 = por %p2275_p6, %p2274_p1 }
  0x7a   : > { %1966 = vmatprep.subr.msk.bf16.mxu0 %vm1722_vm11, %v2348_v9  ;;  %vm1730_vm15 = vmpackc.low %vm250_vm10, %vm249_vm12  ;;  %vm3313_vm2 = vcmp.eq.s32.totalorder %v2603_v13, %v2540_v1  ;;  %v1685_v33 = vsel %vm245_vm14, 1.0, %v2349_v28  ;;  %vm3314_vm3 = vcmp.eq.s32.totalorder %v2609_v15, %v2540_v1 }
  0x7b   : > { %v1684_v30 = vsel %vm3313_vm2, 1.0, %v2349_v28  ;;  %p2277_p13 = pnand %p2276_p8, %p2270_p10 }
  0x7d   : > { %1967 = vmatpush3.bf16.msk.msra.mxu0 %vm1722_vm11, %v2348_v9  ;;  %vm1728_vm11 = vmpackc.low %vm248_vm13, %vm247_vm5 }
  0x7e   : > { %1968 = vmatprep.subr.msk.bf16.mxu0 %vm1724_vm4, %v2348_v9 }
  0x81   : > { %1969 = vmatpush3.bf16.msk.msra.mxu0 %vm1724_vm4, %v2348_v9 }
  0x82   : > { %1970 = vmatprep.subr.msk.bf16.mxu0 %vm1726_vm8, %v2348_v9 }
  0x85   : > { %1971 = vmatpush3.bf16.msk.msra.mxu0 %vm1726_vm8, %v2348_v9 }
  0x86   : > { %1972 = vmatprep.subr.msk.bf16.mxu0 %vm1728_vm11, %v2348_v9 }
  0x89   : > { %1973 = vmatpush3.bf16.msk.msra.mxu0 %vm1728_vm11, %v2348_v9 }
  0x8a   : > { %1974 = vmatprep.subr.msk.bf16.mxu0 %vm1730_vm15, %v2348_v9 }
  0x8d   : > { %1975 = vmatpush3.bf16.msk.msra.mxu0 %vm1730_vm15, %v2348_v9  ;;  %v325_v9 = vmul.f32 %v1681_v51, %v2679_v32  ;;  %v295_v51 = vmul.f32 %v1685_v33, %v2677_v31 }
  0x90   : > { %1977 = vmatmul.mubr.bf16.vlgmr.msra.gmra.mrb[0].mxu0 %v2163_v20  ;;  %v323_v20 = vmul.f32 %v1679_v46, %v2679_v32 }
  0x91   : > { %1980 = vmatprep.mubr.bf16.mxu0 %v2164_v21  ;;  %v324_v21 = vmul.f32 %v1680_v47, %v2679_v32 }
  0x98   : > { %1981 = vmatmul.mubr.bf16.gmra.mrb[4].mxu0 %v2165_v22  ;;  %v292_v22 = vmul.f32 %v1682_v52, %v2677_v31 }
  0x99   : > { %1984 = vmatprep.mubr.bf16.mxu0 %v2166_v23 }
  0xa0   : > { %1985 = vmatmul.mubr.bf16.gmra.mrb[8].mxu0 %v2167_v24  ;;  %v326_v24 = vmul.f32 %v1682_v52, %v2679_v32  ;;  %v329_v52 = vmul.f32 %v1685_v33, %v2679_v32 }
  0xa1   : > { %1988 = vmatprep.mubr.bf16.mxu0 %v2168_v25  ;;  %v1683_v25 = vsel %vm3312_vm1, 1.0, %v2349_v28 }
  0xa8   : > { %1989 = vmatmul.mubr.bf16.gmra.mrb[12].mxu0 %v2169_v26 }
 0x163   : > { %v1978_v45 = vpop.f32.mrb[0].mxu0 }
 0x164   : > { %v541_v48 = vmul.f32 %v1978_v45, %v2689_v35  ;;  %v607_v49 = vmul.f32 %v1978_v45, %v2691_v36  ;;  %v458_v50 = vpop.f32.mrb[1].mxu0 }
 0x165   : > { %v539_v53 = vmul.f32 %v2689_v35, %v458_v50  ;;  %v605_v54 = vmul.f32 %v2691_v36, %v458_v50  ;;  %v1979_v55 = vpop.f32.mrb[2].mxu0 }
 0x166   : > { %v2721_v56 = vadd.f32 %v541_v48, %v287_v39  ;;  %v2723_v57 = vadd.f32 %v607_v49, %v321_v40  ;;  %v542_v58 = vmul.f32 %v1979_v55, %v2689_v35  ;;  %v608_v59 = vmul.f32 %v1979_v55, %v2691_v36  ;;  %v461_v60 = vpop.f32.mrb[3].mxu0 }
 0x167   : > { %v2727_v61 = vadd.f32 %v539_v53, %v285_v37  ;;  %v2729_v62 = vadd.f32 %v605_v54, %v319_v41  ;;  %v671_v63 = vpack.c.bf16 %v1979_v55, %v1978_v45  ;;  %v540_v0 = vmul.f32 %v2689_v35, %v461_v60 }
 0x168   : > { %v2732_v2 = vadd.f32 %v542_v58, %v288_v43  ;;  %v2734_v3 = vadd.f32 %v608_v59, %v322_v44  ;;  %v606_v4 = vmul.f32 %v2691_v36, %v461_v60  ;;  %v670_v5 = vpack.c.bf16 %v461_v60, %v458_v50 }
 0x169   : > { %v2737_v6 = vadd.f32 %v540_v0, %v286_v38  ;;  %v1686_v49 = vsel %vm3314_vm3, 1.0, %v2349_v28  ;;  %v293_v54 = vmul.f32 %v1683_v25, %v2677_v31  ;;  %v294_v55 = vmul.f32 %v1684_v30, %v2677_v31 }
 0x16a   : > { %v2742_v10 = vadd.f32 %v606_v4, %v320_v42  ;;  %1992 = vmatprep.subr.bf16.mxu1 %v670_v5  ;;  %v327_v58 = vmul.f32 %v1683_v25, %v2679_v32  ;;  %v328_v59 = vmul.f32 %v1684_v30, %v2679_v32  ;;  %v296_v60 = vmul.f32 %v1686_v49, %v2677_v31 }
 0x16b   : > { %1993 = vmatpush3.bf16.msra.mxu1 %v670_v5  ;;  %v1982_v23 = vpop.f32.mrb[4].mxu0 }
 0x16c   : > { %v545_v26 = vmul.f32 %v1982_v23, %v2689_v35  ;;  %v611_v27 = vmul.f32 %v1982_v23, %v2691_v36  ;;  %1994 = vmatprep.subr.bf16.mxu1 %v671_v63  ;;  %v474_v29 = vpop.f32.mrb[5].mxu0 }
 0x16d   : > { %v543_v34 = vmul.f32 %v2689_v35, %v474_v29  ;;  %v609_v12 = vmul.f32 %v2691_v36, %v474_v29  ;;  %v1983_v37 = vpop.f32.mrb[6].mxu0 }
 0x16e   : > { %v2765_v38 = vadd.f32 %v545_v26, %v291_v8  ;;  %v2767_v39 = vadd.f32 %v611_v27, %v325_v9  ;;  %v546_v40 = vmul.f32 %v1983_v37, %v2689_v35  ;;  %v612_v41 = vmul.f32 %v1983_v37, %v2691_v36  ;;  %v477_v13 = vpop.f32.mrb[7].mxu0 }
 0x16f   : > { %v2771_v42 = vadd.f32 %v543_v34, %v289_v7  ;;  %v2773_v43 = vadd.f32 %v609_v12, %v323_v20  ;;  %v673_v14 = vpack.c.bf16 %v1983_v37, %v1982_v23  ;;  %v544_v44 = vmul.f32 %v2689_v35, %v477_v13  ;;  %1995 = vmatpush3.bf16.msra.mxu1 %v671_v63 }
 0x170   : > { %v2776_v45 = vadd.f32 %v546_v40, %v292_v22  ;;  %v2778_v46 = vadd.f32 %v612_v41, %v326_v24  ;;  %v610_v47 = vmul.f32 %v2691_v36, %v477_v13  ;;  %v672_v48 = vpack.c.bf16 %v477_v13, %v474_v29 }
 0x171   : > { %v2785_v50 = vadd.f32 %v544_v44, %v290_v11  ;;  %v330_v63 = vmul.f32 %v1686_v49, %v2679_v32  ;;  %v1687_v7 = vsel %vm247_vm5, 1.0, %v2349_v28  ;;  %v1689_v8 = vsel %vm249_vm12, 1.0, %v2349_v28 }
 0x172   : > { %v2789_v53 = vadd.f32 %v610_v47, %v324_v21  ;;  %1996 = vmatprep.subr.bf16.mxu1 %v672_v48  ;;  %v1690_v12 = vsel %vm250_vm10, 1.0, %v2349_v28  ;;  %v1688_v40 = vsel %vm248_vm13, 1.0, %v2349_v28  ;;  %v299_v41 = vmul.f32 %v1689_v8, %v2677_v31 }
 0x173   : > { %1997 = vmatpush3.bf16.msra.mxu1 %v672_v48  ;;  %v1986_v15 = vpop.f32.mrb[8].mxu0  ;;  %v333_v13 = vmul.f32 %v1689_v8, %v2679_v32  ;;  %v297_v44 = vmul.f32 %v1687_v7, %v2677_v31  ;;  %v331_v47 = vmul.f32 %v1687_v7, %v2679_v32  ;;  %v300_v48 = vmul.f32 %v1690_v12, %v2677_v31 }
 0x174   : > { %v549_v0 = vmul.f32 %v1986_v15, %v2689_v35  ;;  %v615_v4 = vmul.f32 %v1986_v15, %v2691_v36  ;;  %1998 = vmatprep.subr.bf16.mxu1 %v673_v14  ;;  %v490_v5 = vpop.f32.mrb[9].mxu0  ;;  %v334_v49 = vmul.f32 %v1690_v12, %v2679_v32  ;;  %v2869_v12 = vstv %s1774_s7 }
 0x175   : > { %v547_v9 = vmul.f32 %v2689_v35, %v490_v5  ;;  %v613_v11 = vmul.f32 %v2691_v36, %v490_v5  ;;  %v1987_v20 = vpop.f32.mrb[10].mxu0 }
 0x176   : > { %v2809_v21 = vadd.f32 %v549_v0, %v295_v51  ;;  %v2811_v22 = vadd.f32 %v615_v4, %v329_v52  ;;  %v550_v23 = vmul.f32 %v1987_v20, %v2689_v35  ;;  %v616_v24 = vmul.f32 %v1987_v20, %v2691_v36  ;;  %v493_v16 = vpop.f32.mrb[11].mxu0 }
 0x177   : > { %v2815_v25 = vadd.f32 %v547_v9, %v293_v54  ;;  %v2817_v26 = vadd.f32 %v613_v11, %v327_v58  ;;  %v675_v18 = vpack.c.bf16 %v1987_v20, %v1986_v15  ;;  %v548_v27 = vmul.f32 %v2689_v35, %v493_v16  ;;  %1999 = vmatpush3.bf16.msra.mxu1 %v673_v14 }
 0x178   : > { %v2820_v29 = vadd.f32 %v550_v23, %v296_v60  ;;  %v2822_v30 = vadd.f32 %v616_v24, %v330_v63  ;;  %v614_v33 = vmul.f32 %v2691_v36, %v493_v16  ;;  %v674_v34 = vpack.c.bf16 %v493_v16, %v490_v5  ;;  %v2171_v24 = vld [vmem:[#allocation6 + $0x48] sm:$0xff]   ;;  %v2172_v16 = vld [vmem:[#allocation6 + $0x50] sm:$0xff]  }
 0x179   : > { %v2829_v37 = vadd.f32 %v548_v27, %v294_v55  ;;  %v298_v51 = vmul.f32 %v1688_v40, %v2677_v31  ;;  %v332_v52 = vmul.f32 %v1688_v40, %v2679_v32  ;;  %v2175_v27 = vld [vmem:[#allocation6 + $0x68] sm:$0xff]   ;;  %v2871_v40 = vstv %s1791_s8 }
 0x17a   : > { %v2837_v14 = vadd.f32 %v614_v33, %v328_v59  ;;  %2000 = vmatprep.subr.bf16.mxu1 %v674_v34  ;;  %v2176_v33 = vld [vmem:[#allocation6 + $0x70] sm:$0xff]  }
 0x17b   : > { %2001 = vmatpush3.bf16.msra.mxu1 %v674_v34  ;;  %v1990_v19 = vpop.f32.mrb[12].mxu0  ;;  %v2178_v34 = vld [vmem:[#allocation6 + $0x80] sm:$0xff]  }
 0x17c   : > { %v553_v1 = vmul.f32 %v1990_v19, %v2689_v35  ;;  %v619_v17 = vmul.f32 %v1990_v19, %v2691_v36  ;;  %2002 = vmatprep.subr.bf16.mxu1 %v675_v18  ;;  %v506_v28 = vpop.f32.mrb[13].mxu0  ;;  %2040 = vmatprep.mubr.bf16.mxu0 %v2178_v34 }
 0x17d   : > { %v551_v54 = vmul.f32 %v2689_v35, %v506_v28  ;;  %v617_v55 = vmul.f32 %v2691_v36, %v506_v28  ;;  %v1991_v58 = vpop.f32.mrb[14].mxu0 }
 0x17e   : > { %v2849_v59 = vadd.f32 %v553_v1, %v299_v41  ;;  %v2851_v15 = vadd.f32 %v619_v17, %v333_v13  ;;  %v554_v60 = vmul.f32 %v1991_v58, %v2689_v35  ;;  %v620_v63 = vmul.f32 %v1991_v58, %v2691_v36  ;;  %v509_v0 = vpop.f32.mrb[15].mxu0 }
 0x17f   : > { %v2855_v4 = vadd.f32 %v551_v54, %v297_v44  ;;  %v2857_v5 = vadd.f32 %v617_v55, %v331_v47  ;;  %v677_v31 = vpack.c.bf16 %v1991_v58, %v1990_v19  ;;  %v552_v32 = vmul.f32 %v2689_v35, %v509_v0  ;;  %2003 = vmatpush3.bf16.msra.mxu1 %v675_v18  ;;  %v2173_v35 = vld [vmem:[#allocation6 + $0x58] sm:$0xff]   ;;  %v2174_v18 = vld [vmem:[#allocation6 + $0x60] sm:$0xff]  }
 0x180   : > { %v2860_v7 = vadd.f32 %v554_v60, %v300_v48  ;;  %v2862_v8 = vadd.f32 %v620_v63, %v334_v49  ;;  %v618_v9 = vmul.f32 %v2691_v36, %v509_v0  ;;  %v676_v11 = vpack.c.bf16 %v509_v0, %v506_v28  ;;  %v2177_v36 = vld [vmem:[#allocation6 + $0x78] sm:$0xff]  }
 0x181   : > { %v2865_v20 = vadd.f32 %v552_v32, %v298_v51 }
 0x182   : > { %v2867_v23 = vadd.f32 %v618_v9, %v332_v52  ;;  %2004 = vmatprep.subr.bf16.mxu1 %v676_v11 }
 0x183   : > { %2005 = vmatpush3.bf16.msra.mxu1 %v676_v11 }
 0x184   : > { %2006 = vmatprep.subr.bf16.mxu1 %v677_v31 }
 0x187   : > { %2007 = vmatpush3.bf16.msra.mxu1 %v677_v31 }
 0x18a   : > { %2009 = vmatmul.mubr.bf16.vlgmr.msra.gmra.mrb[0].mxu1 %v2171_v24 }
 0x18b   : > { %2012 = vmatprep.mubr.bf16.mxu1 %v2172_v16 }
 0x192   : > { %2013 = vmatmul.mubr.bf16.gmra.mrb[4].mxu1 %v2173_v35 }
 0x193   : > { %2016 = vmatprep.mubr.bf16.mxu1 %v2174_v18 }
 0x19a   : > { %2017 = vmatmul.mubr.bf16.gmra.mrb[8].mxu1 %v2175_v27 }
 0x19b   : > { %2020 = vmatprep.mubr.bf16.mxu1 %v2176_v33 }
 0x1a2   : > { %2021 = vmatmul.mubr.bf16.gmra.mrb[12].mxu1 %v2177_v36 }
 0x25d   : > { %v2010_v41 = vpop.f32.mrb[0].mxu1 }
 0x25e   : > { %v843_v13 = vmul.f32 %v2010_v41, %v2869_v12  ;;  %v909_v44 = vmul.f32 %v2010_v41, %v2871_v40  ;;  %v760_v47 = vpop.f32.mrb[1].mxu1 }
 0x25f   : > { %v841_v19 = vmul.f32 %v2869_v12, %v760_v47  ;;  %v907_v48 = vmul.f32 %v2871_v40, %v760_v47  ;;  %v2011_v49 = vpop.f32.mrb[2].mxu1 }
 0x260   : > { %v2878_v1 = vadd.f32 %v843_v13, %v2721_v56  ;;  %v2881_v17 = vadd.f32 %v909_v44, %v2723_v57  ;;  %v844_v28 = vmul.f32 %v2011_v49, %v2869_v12  ;;  %v910_v51 = vmul.f32 %v2011_v49, %v2871_v40  ;;  %v763_v52 = vpop.f32.mrb[3].mxu1 }
 0x261   : > { %v2886_v54 = vadd.f32 %v841_v19, %v2727_v61  ;;  %v2889_v55 = vadd.f32 %v907_v48, %v2729_v62  ;;  %v973_v58 = vpack.c.bf16 %v2011_v49, %v2010_v41  ;;  %v842_v60 = vmul.f32 %v2869_v12, %v763_v52 }
 0x262   : > { %v2893_v56 = vadd.f32 %v844_v28, %v2732_v2  ;;  %v2896_v57 = vadd.f32 %v910_v51, %v2734_v3  ;;  %v908_v63 = vmul.f32 %v2871_v40, %v763_v52  ;;  %v972_v0 = vpack.c.bf16 %v763_v52, %v760_v47 }
 0x263   : > { %v2900_v31 = vadd.f32 %v842_v60, %v2737_v6 }
 0x264   : > { %v2903_v61 = vadd.f32 %v908_v63, %v2742_v10  ;;  %2024 = vmatprep.subr.bf16.mxu0 %v972_v0 }
 0x265   : > { %2025 = vmatpush3.bf16.msra.mxu0 %v972_v0  ;;  %v2014_v62 = vpop.f32.mrb[4].mxu1 }
 0x266   : > { %v847_v32 = vmul.f32 %v2014_v62, %v2869_v12  ;;  %v913_v2 = vmul.f32 %v2014_v62, %v2871_v40  ;;  %2026 = vmatprep.subr.bf16.mxu0 %v973_v58  ;;  %v776_v9 = vpop.f32.mrb[5].mxu1 }
 0x267   : > { %v845_v3 = vmul.f32 %v2869_v12, %v776_v9  ;;  %v911_v11 = vmul.f32 %v2871_v40, %v776_v9  ;;  %v2015_v24 = vpop.f32.mrb[6].mxu1 }
 0x268   : > { %v2910_v6 = vadd.f32 %v847_v32, %v2765_v38  ;;  %v2913_v10 = vadd.f32 %v913_v2, %v2767_v39  ;;  %v848_v16 = vmul.f32 %v2015_v24, %v2869_v12  ;;  %v914_v35 = vmul.f32 %v2015_v24, %v2871_v40  ;;  %v779_v18 = vpop.f32.mrb[7].mxu1 }
 0x269   : > { %v2918_v27 = vadd.f32 %v845_v3, %v2771_v42  ;;  %v2921_v33 = vadd.f32 %v911_v11, %v2773_v43  ;;  %v975_v36 = vpack.c.bf16 %v2015_v24, %v2014_v62  ;;  %v846_v34 = vmul.f32 %v2869_v12, %v779_v18  ;;  %2027 = vmatpush3.bf16.msra.mxu0 %v973_v58 }
 0x26a   : > { %v2925_v38 = vadd.f32 %v848_v16, %v2776_v45  ;;  %v2928_v39 = vadd.f32 %v914_v35, %v2778_v46  ;;  %v912_v41 = vmul.f32 %v2871_v40, %v779_v18  ;;  %v974_v13 = vpack.c.bf16 %v779_v18, %v776_v9 }
 0x26b   : > { %v2932_v44 = vadd.f32 %v846_v34, %v2785_v50 }
 0x26c   : > { %v2935_v42 = vadd.f32 %v912_v41, %v2789_v53  ;;  %2028 = vmatprep.subr.bf16.mxu0 %v974_v13 }
 0x26d   : > { %2029 = vmatpush3.bf16.msra.mxu0 %v974_v13  ;;  %v2018_v43 = vpop.f32.mrb[8].mxu1 }
 0x26e   : > { %v851_v47 = vmul.f32 %v2018_v43, %v2869_v12  ;;  %v917_v45 = vmul.f32 %v2018_v43, %v2871_v40  ;;  %2030 = vmatprep.subr.bf16.mxu0 %v975_v36  ;;  %v792_v19 = vpop.f32.mrb[9].mxu1 }
 0x26f   : > { %v849_v46 = vmul.f32 %v2869_v12, %v792_v19  ;;  %v915_v48 = vmul.f32 %v2871_v40, %v792_v19  ;;  %v2019_v49 = vpop.f32.mrb[10].mxu1 }
 0x270   : > { %v2942_v50 = vadd.f32 %v851_v47, %v2809_v21  ;;  %v2945_v53 = vadd.f32 %v917_v45, %v2811_v22  ;;  %v852_v28 = vmul.f32 %v2019_v49, %v2869_v12  ;;  %v918_v51 = vmul.f32 %v2019_v49, %v2871_v40  ;;  %v795_v52 = vpop.f32.mrb[11].mxu1 }
 0x271   : > { %v2950_v58 = vadd.f32 %v849_v46, %v2815_v25  ;;  %v2953_v60 = vadd.f32 %v915_v48, %v2817_v26  ;;  %v977_v63 = vpack.c.bf16 %v2019_v49, %v2018_v43  ;;  %v850_v0 = vmul.f32 %v2869_v12, %v795_v52  ;;  %2031 = vmatpush3.bf16.msra.mxu0 %v975_v36 }
 0x272   : > { %v2957_v21 = vadd.f32 %v852_v28, %v2820_v29  ;;  %v2960_v22 = vadd.f32 %v918_v51, %v2822_v30  ;;  %v916_v62 = vmul.f32 %v2871_v40, %v795_v52  ;;  %v976_v32 = vpack.c.bf16 %v795_v52, %v792_v19  ;;  %v2184_v19 = vld [vmem:[#allocation6 + $0xb0] sm:$0xff]  }
 0x273   : > { %v2964_v2 = vadd.f32 %v850_v0, %v2829_v37  ;;  %v3001_v46 = vstv %s1816_s10  ;;  %v3003_v48 = vstv %s1833_s11 }
 0x274   : > { %v2967_v25 = vadd.f32 %v916_v62, %v2837_v14  ;;  %2032 = vmatprep.subr.bf16.mxu0 %v976_v32 }
 0x275   : > { %2033 = vmatpush3.bf16.msra.mxu0 %v976_v32  ;;  %v2022_v26 = vpop.f32.mrb[12].mxu1 }
 0x276   : > { %v855_v9 = vmul.f32 %v2022_v26, %v2869_v12  ;;  %v921_v29 = vmul.f32 %v2022_v26, %v2871_v40  ;;  %2034 = vmatprep.subr.bf16.mxu0 %v977_v63  ;;  %v808_v3 = vpop.f32.mrb[13].mxu1 }
 0x277   : > { %v853_v30 = vmul.f32 %v2869_v12, %v808_v3  ;;  %v919_v11 = vmul.f32 %v2871_v40, %v808_v3  ;;  %v2023_v24 = vpop.f32.mrb[14].mxu1 }
 0x278   : > { %v2974_v37 = vadd.f32 %v855_v9, %v2849_v59  ;;  %v2977_v14 = vadd.f32 %v921_v29, %v2851_v15  ;;  %v856_v16 = vmul.f32 %v2023_v24, %v2869_v12  ;;  %v922_v35 = vmul.f32 %v2023_v24, %v2871_v40  ;;  %v811_v18 = vpop.f32.mrb[15].mxu1 }
 0x279   : > { %v2982_v36 = vadd.f32 %v853_v30, %v2855_v4  ;;  %v2985_v34 = vadd.f32 %v919_v11, %v2857_v5  ;;  %v979_v41 = vpack.c.bf16 %v2023_v24, %v2022_v26  ;;  %v854_v13 = vmul.f32 %v2869_v12, %v811_v18  ;;  %2035 = vmatpush3.bf16.msra.mxu0 %v977_v63  ;;  %v2179_v5 = vld [vmem:[#allocation6 + $0x88] sm:$0xff]   ;;  %v2180_v12 = vld [vmem:[#allocation6 + $0x90] sm:$0xff]  }
 0x27a   : > { %v2989_v59 = vadd.f32 %v856_v16, %v2860_v7  ;;  %v2992_v15 = vadd.f32 %v922_v35, %v2862_v8  ;;  %v920_v43 = vmul.f32 %v2871_v40, %v811_v18  ;;  %v978_v47 = vpack.c.bf16 %v811_v18, %v808_v3  ;;  %v2181_v7 = vld [vmem:[#allocation6 + $0x98] sm:$0xff]   ;;  %v2182_v8 = vld [vmem:[#allocation6 + $0xa0] sm:$0xff]   ;;  %v2183_v40 = vld [vmem:[#allocation6 + $0xa8] sm:$0xff]  }
 0x27b   : > { %v2996_v45 = vadd.f32 %v854_v13, %v2865_v20  ;;  %v2185_v20 = vld [vmem:[#allocation6 + $0xb8] sm:$0xff]  }
 0x27c   : > { %v2999_v4 = vadd.f32 %v920_v43, %v2867_v23  ;;  %2036 = vmatprep.subr.bf16.mxu0 %v978_v47  ;;  %v2186_v23 = vld [vmem:[#allocation6 + $0xc0] sm:$0xff]  }
 0x27d   : > { %2037 = vmatpush3.bf16.msra.mxu0 %v978_v47  ;;  %2072 = vmatprep.mubr.bf16.mxu1 %v2186_v23 }
 0x27e   : > { %2038 = vmatprep.subr.bf16.mxu0 %v979_v41 }
 0x281   : > { %2039 = vmatpush3.bf16.msra.mxu0 %v979_v41 }
 0x284   : > { %2041 = vmatmul.mubr.bf16.vlgmr.msra.gmra.mrb[16].mxu0 %v2179_v5 }
 0x285   : > { %2044 = vmatprep.mubr.bf16.mxu0 %v2180_v12 }
 0x28c   : > { %2045 = vmatmul.mubr.bf16.gmra.mrb[20].mxu0 %v2181_v7 }
 0x28d   : > { %2048 = vmatprep.mubr.bf16.mxu0 %v2182_v8 }
 0x294   : > { %2049 = vmatmul.mubr.bf16.gmra.mrb[24].mxu0 %v2183_v40 }
 0x295   : > { %2052 = vmatprep.mubr.bf16.mxu0 %v2184_v19 }
 0x29c   : > { %2053 = vmatmul.mubr.bf16.gmra.mrb[28].mxu0 %v2185_v20 }
 0x357   : > { %v2042_v49 = vpop.f32.mrb[16].mxu0 }
 0x358   : > { %v1145_v28 = vmul.f32 %v2042_v49, %v3001_v46  ;;  %v1211_v51 = vmul.f32 %v2042_v49, %v3003_v48  ;;  %v1062_v52 = vpop.f32.mrb[17].mxu0 }
 0x359   : > { %v1143_v63 = vmul.f32 %v3001_v46, %v1062_v52  ;;  %v1209_v0 = vmul.f32 %v3003_v48, %v1062_v52  ;;  %v2043_v62 = vpop.f32.mrb[18].mxu0 }
 0x35a   : > { %v3010_v32 = vadd.f32 %v1145_v28, %v2878_v1  ;;  %v3013_v26 = vadd.f32 %v1211_v51, %v2881_v17  ;;  %v1146_v9 = vmul.f32 %v2043_v62, %v3001_v46  ;;  %v1212_v29 = vmul.f32 %v2043_v62, %v3003_v48  ;;  %v1065_v3 = vpop.f32.mrb[19].mxu0 }
 0x35b   : > { %v3018_v30 = vadd.f32 %v1143_v63, %v2886_v54  ;;  %v3021_v11 = vadd.f32 %v1209_v0, %v2889_v55  ;;  %v1275_v24 = vpack.c.bf16 %v2043_v62, %v2042_v49  ;;  %v1144_v16 = vmul.f32 %v3001_v46, %v1065_v3 }
 0x35c   : > { %v3025_v1 = vadd.f32 %v1146_v9, %v2893_v56  ;;  %v3028_v17 = vadd.f32 %v1212_v29, %v2896_v57  ;;  %v1210_v35 = vmul.f32 %v3003_v48, %v1065_v3  ;;  %v1274_v18 = vpack.c.bf16 %v1065_v3, %v1062_v52 }
 0x35d   : > { %v3032_v41 = vadd.f32 %v1144_v16, %v2900_v31 }
 0x35e   : > { %v3035_v54 = vadd.f32 %v1210_v35, %v2903_v61  ;;  %2056 = vmatprep.subr.bf16.mxu1 %v1274_v18 }
 0x35f   : > { %2057 = vmatpush3.bf16.msra.mxu1 %v1274_v18  ;;  %v2046_v55 = vpop.f32.mrb[20].mxu0 }
 0x360   : > { %v1149_v13 = vmul.f32 %v2046_v55, %v3001_v46  ;;  %v1215_v56 = vmul.f32 %v2046_v55, %v3003_v48  ;;  %2058 = vmatprep.subr.bf16.mxu1 %v1275_v24  ;;  %v1078_v43 = vpop.f32.mrb[21].mxu0 }
 0x361   : > { %v1147_v57 = vmul.f32 %v3001_v46, %v1078_v43  ;;  %v1213_v47 = vmul.f32 %v3003_v48, %v1078_v43  ;;  %v2047_v5 = vpop.f32.mrb[22].mxu0 }
 0x362   : > { %v3042_v31 = vadd.f32 %v1149_v13, %v2910_v6  ;;  %v3045_v61 = vadd.f32 %v1215_v56, %v2913_v10  ;;  %v1150_v12 = vmul.f32 %v2047_v5, %v3001_v46  ;;  %v1216_v7 = vmul.f32 %v2047_v5, %v3003_v48  ;;  %v1081_v8 = vpop.f32.mrb[23].mxu0 }
 0x363   : > { %v3050_v40 = vadd.f32 %v1147_v57, %v2918_v27  ;;  %v3053_v19 = vadd.f32 %v1213_v47, %v2921_v33  ;;  %v1277_v20 = vpack.c.bf16 %v2047_v5, %v2046_v55  ;;  %v1148_v23 = vmul.f32 %v3001_v46, %v1081_v8  ;;  %2059 = vmatpush3.bf16.msra.mxu1 %v1275_v24 }
 0x364   : > { %v3057_v6 = vadd.f32 %v1150_v12, %v2925_v38  ;;  %v3060_v10 = vadd.f32 %v1216_v7, %v2928_v39  ;;  %v1214_v49 = vmul.f32 %v3003_v48, %v1081_v8  ;;  %v1276_v28 = vpack.c.bf16 %v1081_v8, %v1078_v43 }
 0x365   : > { %v3064_v51 = vadd.f32 %v1148_v23, %v2932_v44 }
 0x366   : > { %v3067_v27 = vadd.f32 %v1214_v49, %v2935_v42  ;;  %2060 = vmatprep.subr.bf16.mxu1 %v1276_v28 }
 0x367   : > { %2061 = vmatpush3.bf16.msra.mxu1 %v1276_v28  ;;  %v2050_v33 = vpop.f32.mrb[24].mxu0 }
 0x368   : > { %v1153_v52 = vmul.f32 %v2050_v33, %v3001_v46  ;;  %v1219_v38 = vmul.f32 %v2050_v33, %v3003_v48  ;;  %2062 = vmatprep.subr.bf16.mxu1 %v1277_v20  ;;  %v1094_v63 = vpop.f32.mrb[25].mxu0 }
 0x369   : > { %v1151_v39 = vmul.f32 %v3001_v46, %v1094_v63  ;;  %v1217_v0 = vmul.f32 %v3003_v48, %v1094_v63  ;;  %v2051_v62 = vpop.f32.mrb[26].mxu0 }
 0x36a   : > { %v3074_v44 = vadd.f32 %v1153_v52, %v2942_v50  ;;  %v3077_v42 = vadd.f32 %v1219_v38, %v2945_v53  ;;  %v1154_v9 = vmul.f32 %v2051_v62, %v3001_v46  ;;  %v1220_v29 = vmul.f32 %v2051_v62, %v3003_v48  ;;  %v1097_v3 = vpop.f32.mrb[27].mxu0 }
 0x36b   : > { %v3082_v24 = vadd.f32 %v1151_v39, %v2950_v58  ;;  %v3085_v16 = vadd.f32 %v1217_v0, %v2953_v60  ;;  %v1279_v35 = vpack.c.bf16 %v2051_v62, %v2050_v33  ;;  %v1152_v18 = vmul.f32 %v3001_v46, %v1097_v3  ;;  %2063 = vmatpush3.bf16.msra.mxu1 %v1277_v20 }
 0x36c   : > { %v3089_v50 = vadd.f32 %v1154_v9, %v2957_v21  ;;  %v3092_v53 = vadd.f32 %v1220_v29, %v2960_v22  ;;  %v1218_v55 = vmul.f32 %v3003_v48, %v1097_v3  ;;  %v1278_v13 = vpack.c.bf16 %v1097_v3, %v1094_v63  ;;  %v2192_v63 = vld [vmem:[#allocation6 + $0xf0] sm:$0xff]  }
 0x36d   : > { %v3096_v56 = vadd.f32 %v1152_v18, %v2964_v2  ;;  %v3135_v39 = vstv %s1875_s21 }
 0x36e   : > { %v3099_v58 = vadd.f32 %v1218_v55, %v2967_v25  ;;  %2064 = vmatprep.subr.bf16.mxu1 %v1278_v13 }
 0x36f   : > { %2065 = vmatpush3.bf16.msra.mxu1 %v1278_v13  ;;  %v2054_v60 = vpop.f32.mrb[28].mxu0 }
 0x370   : > { %v1157_v43 = vmul.f32 %v2054_v60, %v3001_v46  ;;  %v1223_v21 = vmul.f32 %v2054_v60, %v3003_v48  ;;  %2066 = vmatprep.subr.bf16.mxu1 %v1279_v35  ;;  %v1110_v57 = vpop.f32.mrb[29].mxu0 }
 0x371   : > { %v1155_v22 = vmul.f32 %v3001_v46, %v1110_v57  ;;  %v1221_v47 = vmul.f32 %v3003_v48, %v1110_v57  ;;  %v2055_v5 = vpop.f32.mrb[30].mxu0 }
 0x372   : > { %v3106_v2 = vadd.f32 %v1157_v43, %v2974_v37  ;;  %v3109_v25 = vadd.f32 %v1223_v21, %v2977_v14  ;;  %v1158_v12 = vmul.f32 %v2055_v5, %v3001_v46  ;;  %v1224_v7 = vmul.f32 %v2055_v5, %v3003_v48  ;;  %v1113_v8 = vpop.f32.mrb[31].mxu0 }
 0x373   : > { %v3114_v20 = vadd.f32 %v1155_v22, %v2982_v36  ;;  %v3117_v23 = vadd.f32 %v1221_v47, %v2985_v34  ;;  %v1281_v49 = vpack.c.bf16 %v2055_v5, %v2054_v60  ;;  %v1156_v28 = vmul.f32 %v3001_v46, %v1113_v8  ;;  %2067 = vmatpush3.bf16.msra.mxu1 %v1279_v35  ;;  %v2187_v34 = vld [vmem:[#allocation6 + $0xc8] sm:$0xff]   ;;  %v2188_v46 = vld [vmem:[#allocation6 + $0xd0] sm:$0xff]  }
 0x374   : > { %v3121_v37 = vadd.f32 %v1158_v12, %v2989_v59  ;;  %v3124_v14 = vadd.f32 %v1224_v7, %v2992_v15  ;;  %v1222_v33 = vmul.f32 %v3003_v48, %v1113_v8  ;;  %v1280_v52 = vpack.c.bf16 %v1113_v8, %v1110_v57  ;;  %v2189_v59 = vld [vmem:[#allocation6 + $0xd8] sm:$0xff]   ;;  %v2190_v15 = vld [vmem:[#allocation6 + $0xe0] sm:$0xff]   ;;  %v2191_v48 = vld [vmem:[#allocation6 + $0xe8] sm:$0xff]  }
 0x375   : > { %v3128_v38 = vadd.f32 %v1156_v28, %v2996_v45  ;;  %v2193_v45 = vld [vmem:[#allocation6 + $0xf8] sm:$0xff]  }
 0x376   : > { %v3131_v36 = vadd.f32 %v1222_v33, %v2999_v4  ;;  %2068 = vmatprep.subr.bf16.mxu1 %v1280_v52  ;;  %v3133_v4 = vstv %s1858_s17 }
 0x377   : > { %2069 = vmatpush3.bf16.msra.mxu1 %v1280_v52 }
 0x378   : > { %2070 = vmatprep.subr.bf16.mxu1 %v1281_v49 }
 0x37b   : > { %2071 = vmatpush3.bf16.msra.mxu1 %v1281_v49 }
 0x37e   : > { %2073 = vmatmul.mubr.bf16.vlgmr.msra.gmra.mrb[16].mxu1 %v2187_v34 }
 0x37f   : > { %2076 = vmatprep.mubr.bf16.mxu1 %v2188_v46 }
 0x386   : > { %2077 = vmatmul.mubr.bf16.gmra.mrb[20].mxu1 %v2189_v59 }
 0x387   : > { %2080 = vmatprep.mubr.bf16.mxu1 %v2190_v15 }
 0x38e   : > { %2081 = vmatmul.mubr.bf16.gmra.mrb[24].mxu1 %v2191_v48 }
 0x38f   : > { %2084 = vmatprep.mubr.bf16.mxu1 %v2192_v63 }
 0x396   : > { %2085 = vmatmul.mubr.bf16.gmra.mrb[28].mxu1 %v2193_v45 }
 0x451   : > { %v2074_v0 = vpop.f32.mrb[16].mxu1 }
 0x452   : > { %v1447_v62 = vmul.f32 %v2074_v0, %v3133_v4  ;;  %v1513_v9 = vmul.f32 %v2074_v0, %v3135_v39  ;;  %v1364_v29 = vpop.f32.mrb[17].mxu1 }
 0x453   : > { %v1445_v3 = vmul.f32 %v3133_v4, %v1364_v29  ;;  %v1511_v35 = vmul.f32 %v3135_v39, %v1364_v29  ;;  %v2075_v18 = vpop.f32.mrb[18].mxu1 }
 0x454   : > { %v1463_v55 = vadd.f32 %v1447_v62, %v3010_v32  ;;  %v1529_v13 = vadd.f32 %v1513_v9, %v3013_v26  ;;  %v1448_v60 = vmul.f32 %v2075_v18, %v3133_v4  ;;  %v1514_v43 = vmul.f32 %v2075_v18, %v3135_v39  ;;  %v1367_v21 = vpop.f32.mrb[19].mxu1 }
 0x455   : > { %v1461_v57 = vadd.f32 %v1445_v3, %v3018_v30  ;;  %v1527_v22 = vadd.f32 %v1511_v35, %v3021_v11  ;;  %v1446_v47 = vmul.f32 %v3133_v4, %v1367_v21  ;;  %v1512_v5 = vmul.f32 %v3135_v39, %v1367_v21 }
 0x456   : > { %1479 = vst [vmem:[%s3150_s24 + $0x10] sm:$0xff] %v1463_v55  ;;  %1878 = vst [vmem:[%s3150_s24 + $0x90] sm:$0xff] %v1529_v13  ;;  %v1464_v32 = vadd.f32 %v1448_v60, %v3025_v1  ;;  %v1530_v26 = vadd.f32 %v1514_v43, %v3028_v17 }
 0x457   : > { %1477 = vst [vmem:[%s3150_s24] sm:$0xff] %v1461_v57  ;;  %1876 = vst [vmem:[%s3150_s24 + $0x80] sm:$0xff] %v1527_v22  ;;  %v1462_v30 = vadd.f32 %v1446_v47, %v3032_v41  ;;  %v1528_v11 = vadd.f32 %v1512_v5, %v3035_v54 }
 0x458   : > { %1480 = vst [vmem:[%s3150_s24 + $0x18] sm:$0xff] %v1464_v32  ;;  %1879 = vst [vmem:[%s3150_s24 + $0x98] sm:$0xff] %v1530_v26 }
 0x459   : > { %1478 = vst [vmem:[%s3150_s24 + $0x8] sm:$0xff] %v1462_v30  ;;  %1877 = vst [vmem:[%s3150_s24 + $0x88] sm:$0xff] %v1528_v11  ;;  %v2078_v12 = vpop.f32.mrb[20].mxu1 }
 0x45a   : > { %v1451_v7 = vmul.f32 %v2078_v12, %v3133_v4  ;;  %v1517_v8 = vmul.f32 %v2078_v12, %v3135_v39  ;;  %v1380_v1 = vpop.f32.mrb[21].mxu1 }
 0x45b   : > { %v1449_v17 = vmul.f32 %v3133_v4, %v1380_v1  ;;  %v1515_v49 = vmul.f32 %v3135_v39, %v1380_v1  ;;  %v2079_v41 = vpop.f32.mrb[22].mxu1 }
 0x45c   : > { %v1467_v54 = vadd.f32 %v1451_v7, %v3042_v31  ;;  %v1533_v28 = vadd.f32 %v1517_v8, %v3045_v61  ;;  %v1452_v33 = vmul.f32 %v2079_v41, %v3133_v4  ;;  %v1518_v52 = vmul.f32 %v2079_v41, %v3135_v39  ;;  %v1383_v34 = vpop.f32.mrb[23].mxu1 }
 0x45d   : > { %v1465_v46 = vadd.f32 %v1449_v17, %v3050_v40  ;;  %v1531_v59 = vadd.f32 %v1515_v49, %v3053_v19  ;;  %v1450_v15 = vmul.f32 %v3133_v4, %v1383_v34  ;;  %v1516_v48 = vmul.f32 %v3135_v39, %v1383_v34 }
 0x45e   : > { %1483 = vst [vmem:[%s3150_s24 + $0x30] sm:$0xff] %v1467_v54  ;;  %1882 = vst [vmem:[%s3150_s24 + $0xb0] sm:$0xff] %v1533_v28  ;;  %v1468_v31 = vadd.f32 %v1452_v33, %v3057_v6  ;;  %v1534_v61 = vadd.f32 %v1518_v52, %v3060_v10 }
 0x45f   : > { %1481 = vst [vmem:[%s3150_s24 + $0x20] sm:$0xff] %v1465_v46  ;;  %1880 = vst [vmem:[%s3150_s24 + $0xa0] sm:$0xff] %v1531_v59  ;;  %v1466_v63 = vadd.f32 %v1450_v15, %v3064_v51  ;;  %v1532_v45 = vadd.f32 %v1516_v48, %v3067_v27 }
 0x460   : > { %1484 = vst [vmem:[%s3150_s24 + $0x38] sm:$0xff] %v1468_v31  ;;  %1883 = vst [vmem:[%s3150_s24 + $0xb8] sm:$0xff] %v1534_v61 }
 0x461   : > { %1482 = vst [vmem:[%s3150_s24 + $0x28] sm:$0xff] %v1466_v63  ;;  %1881 = vst [vmem:[%s3150_s24 + $0xa8] sm:$0xff] %v1532_v45  ;;  %v2082_v40 = vpop.f32.mrb[24].mxu1 }
 0x462   : > { %v1455_v19 = vmul.f32 %v2082_v40, %v3133_v4  ;;  %v1521_v0 = vmul.f32 %v2082_v40, %v3135_v39  ;;  %v1396_v6 = vpop.f32.mrb[25].mxu1 }
 0x463   : > { %v1453_v10 = vmul.f32 %v3133_v4, %v1396_v6  ;;  %v1519_v62 = vmul.f32 %v3135_v39, %v1396_v6  ;;  %v2083_v51 = vpop.f32.mrb[26].mxu1 }
 0x464   : > { %v1471_v27 = vadd.f32 %v1455_v19, %v3074_v44  ;;  %v1537_v9 = vadd.f32 %v1521_v0, %v3077_v42  ;;  %v1456_v29 = vmul.f32 %v2083_v51, %v3133_v4  ;;  %v1522_v3 = vmul.f32 %v2083_v51, %v3135_v39  ;;  %v1399_v35 = vpop.f32.mrb[27].mxu1 }
 0x465   : > { %v1469_v18 = vadd.f32 %v1453_v10, %v3082_v24  ;;  %v1535_v55 = vadd.f32 %v1519_v62, %v3085_v16  ;;  %v1454_v13 = vmul.f32 %v3133_v4, %v1399_v35  ;;  %v1520_v60 = vmul.f32 %v3135_v39, %v1399_v35 }
 0x466   : > { %1487 = vst [vmem:[%s3150_s24 + $0x50] sm:$0xff] %v1471_v27  ;;  %1886 = vst [vmem:[%s3150_s24 + $0xd0] sm:$0xff] %v1537_v9  ;;  %v1472_v44 = vadd.f32 %v1456_v29, %v3089_v50  ;;  %v1538_v42 = vadd.f32 %v1522_v3, %v3092_v53 }
 0x467   : > { %1485 = vst [vmem:[%s3150_s24 + $0x40] sm:$0xff] %v1469_v18  ;;  %1884 = vst [vmem:[%s3150_s24 + $0xc0] sm:$0xff] %v1535_v55  ;;  %v1470_v43 = vadd.f32 %v1454_v13, %v3096_v56  ;;  %v1536_v24 = vadd.f32 %v1520_v60, %v3099_v58 }
 0x468   : > { %1488 = vst [vmem:[%s3150_s24 + $0x58] sm:$0xff] %v1472_v44  ;;  %1887 = vst [vmem:[%s3150_s24 + $0xd8] sm:$0xff] %v1538_v42 }
 0x469   : > { %1486 = vst [vmem:[%s3150_s24 + $0x48] sm:$0xff] %v1470_v43  ;;  %1885 = vst [vmem:[%s3150_s24 + $0xc8] sm:$0xff] %v1536_v24  ;;  %v2086_v16 = vpop.f32.mrb[28].mxu1 }
 0x46a   : > { %v1459_v21 = vmul.f32 %v2086_v16, %v3133_v4  ;;  %v1525_v57 = vmul.f32 %v2086_v16, %v3135_v39  ;;  %v1412_v22 = vpop.f32.mrb[29].mxu1 }
 0x46b   : > { %v1457_v50 = vmul.f32 %v3133_v4, %v1412_v22  ;;  %v1523_v53 = vmul.f32 %v3135_v39, %v1412_v22  ;;  %v2087_v56 = vpop.f32.mrb[30].mxu1 }
 0x46c   : > { %v1475_v58 = vadd.f32 %v1459_v21, %v3106_v2  ;;  %v1541_v47 = vadd.f32 %v1525_v57, %v3109_v25  ;;  %v1460_v5 = vmul.f32 %v2087_v56, %v3133_v4  ;;  %v1526_v32 = vmul.f32 %v2087_v56, %v3135_v39  ;;  %v1415_v26 = vpop.f32.mrb[31].mxu1 }
 0x46d   : > { %v1473_v30 = vadd.f32 %v1457_v50, %v3114_v20  ;;  %v1539_v11 = vadd.f32 %v1523_v53, %v3117_v23  ;;  %v1458_v12 = vmul.f32 %v3133_v4, %v1415_v26  ;;  %v1524_v2 = vmul.f32 %v3135_v39, %v1415_v26 }
 0x46e   : > { %1491 = vst [vmem:[%s3150_s24 + $0x70] sm:$0xff] %v1475_v58  ;;  %1890 = vst [vmem:[%s3150_s24 + $0xf0] sm:$0xff] %v1541_v47  ;;  %v1476_v25 = vadd.f32 %v1460_v5, %v3121_v37  ;;  %v1542_v20 = vadd.f32 %v1526_v32, %v3124_v14 }
 0x46f   : > { %1489 = vst [vmem:[%s3150_s24 + $0x60] sm:$0xff] %v1473_v30  ;;  %1888 = vst [vmem:[%s3150_s24 + $0xe0] sm:$0xff] %v1539_v11  ;;  %v1474_v23 = vadd.f32 %v1458_v12, %v3128_v38  ;;  %v1540_v4 = vadd.f32 %v1524_v2, %v3131_v36 }
 0x470   : > { %1492 = vst [vmem:[%s3150_s24 + $0x78] sm:$0xff] %v1476_v25  ;;  %1891 = vst [vmem:[%s3150_s24 + $0xf8] sm:$0xff] %v1542_v20 }
 0x471   : > { %1490 = vst [vmem:[%s3150_s24 + $0x68] sm:$0xff] %v1474_v23  ;;  %1889 = vst [vmem:[%s3150_s24 + $0xe8] sm:$0xff] %v1540_v4 }
 0x472   : > { %2280 = shalt.err (!%p2277_p13)
}
 0x473   : > { %s2281_s7 = scalar_lea.hbm %s3229_s5, 4096  ;;  %s2285_s11 = scalar_lea.hbm %s3290_s3, 8192 }
 0x474   : > { %p2282_p4 = scmp.ne.s32.totalorder %s3229_s5, %s2281_s7  ;;  %p2286_p11 = scmp.lt.u32.totalorder %s3229_s5, %s3290_s3 }
 0x475   : > { %p2287_p3 = scmp.lt.u32.totalorder %s2285_s11, %s2281_s7  ;;  %p2289_p9 = scmp.lt.u32.totalorder %s2281_s7, %s3229_s5 }
 0x476   : > { %p2283_p2 = pnand %p2282_p4, %p2475_p7 }
 0x477   : > { %p2288_p5 = por %p2287_p3, %p2286_p11 }
 0x478   : > { %p2284_p0 = pneg %p2283_p2 }
 0x479   : > { %p2290_p12 = por %p2289_p9, %p2288_p5 }
 0x47b   : > { %p2291_p10 = pnand %p2290_p12, %p2284_p0 }
 0x47d   : > { %2294 = shalt.err (!%p2291_p10)
}
 0x47e   : > { %s2351_s23 = smov 128   ;;  %s2352_s24 = smov 256  }
 0x47f   : > { %s2353_s28 = smov 8  }
 0x480   : > { %2098 = dma.vmem_to_hbm [thread:$0]  (%p2475_p7), %s3235_s29, 4096, %s3229_s5, %s1560_s9, %s2351_s23, %s2352_s24, %s2353_s28  }
 0x481 PF: > { %s1587_s16 = sand.u32 1, %s2329_s12   ;;  %p3315_p1 = scmp.ne.s32.totalorder %s3299_s19, 0 }
 0x482   : > { %p3316_p6 = scmp.ge.s32.totalorder %s2341_s15, 2  ;;  %s1588_s25 = scalar_lea.sflag [#allocation4], %s1587_s16 }
 0x484   : > { %p2112_p8 = pnand %p3316_p6, %p3315_p1 }
 0x486   : > { %2324 = dma.done.wait (!%p2112_p8), %s1588_s25, 4096  }
 0x487   : > { %2326 = vsyncadd (!%p2112_p8), %s1588_s25, 4294963200  ;;  %p18_p13 = scmp.ge.s32.totalorder %s2465_s22, 4   ;;  %s3317_s12 = smov %s2333_s13 }
 0x488   : > { %s3318_s13 = smov %s2337_s14  ;;  %s3319_s14 = smov %s2481_s27 }
 0x489   : > { %s3320_s15 = smov %s2465_s22  ;;  %20 = sbr.rel (!%p18_p13) target bundleno = 7 (0x7), region = 90 }
 0x490   :  { %1593 = vsyncpa [#allocation3], 1 }
 0x491   :  { %1595 = vsyncpa [#allocation3 + $0x1], 1 }
 0x492   :  { %1596 = vsyncpa [#allocation7], 1 }
 0x493   :  { %1597 = vsyncpa [#allocation4], 1 }
 0x494   :  { %1599 = vsyncpa [#allocation4 + $0x1], 1 }
 0x495   :  { %1600 = vsyncpa [#allocation5], 1 }
 0x496   :  { %1602 = vsyncpa [#allocation5 + $0x1], 1 }

</bundles_post_ra>
